<compile_context>
chip_gen: v6e
topology: v6e:2x2x1
jax: 0.10.0
libtpu: 0.0.40
codegen_flags: <defaults>
</compile_context>

<pallas_src>
import functools

import jax
import jax.numpy as jnp
from jax.experimental import pallas as pl
from jax.experimental.pallas import tpu as pltpu


_BLOCK_M = 256  # rows per grid step; fills the 256-row MXU on v6e/v7x.


# ----------------------------------------------------------------------------
# Kernel: one grid step = one (TM, K) tile of batch rows through the full block.
# ----------------------------------------------------------------------------
def linear_res_block_kernel(x_ref, w1_ref, b1_ref, w2_ref, b2_ref,
                            wr_ref, br_ref, o_ref):
    f32 = jnp.float32
    cdt = w1_ref.dtype                        # matmul input dtype (f32 or bf16)

    x = x_ref[...]                            # (TM, K) float32
    xr = jnp.maximum(x, 0.0).astype(cdt)      # af(feature) -> conv1 input

    # conv1 + ReLU
    h = jnp.dot(xr, w1_ref[...], preferred_element_type=f32) + b1_ref[...]
    h = jnp.maximum(h, 0.0).astype(cdt)       # af(conv1(...)) -> conv2 input

    # conv2(...) + conv_res(feature)
    out = (jnp.dot(h, w2_ref[...], preferred_element_type=f32) + b2_ref[...]
           + jnp.dot(x.astype(cdt), wr_ref[...], preferred_element_type=f32)
           + br_ref[...])
    o_ref[...] = out.astype(o_ref.dtype)


PARAM_ORDER = ("w1", "b1", "w2", "b2", "wr", "br")


# ----------------------------------------------------------------------------
# Parameters (PyTorch layout -> kernel layout: weights transposed to (in, out)).
# ----------------------------------------------------------------------------
def make_params(input_size, output_size, key, weights_dtype=jnp.float32):
    def lin(k, out_dim, in_dim, scale=0.05):
        kw, kb = jax.random.split(k)
        w = jax.random.normal(kw, (out_dim, in_dim), jnp.float32) * scale
        b = jax.random.normal(kb, (out_dim,), jnp.float32) * scale
        return w, b

    k1, k2, k3 = jax.random.split(key, 3)
    w1, b1 = lin(k1, input_size, input_size)    # conv1
    w2, b2 = lin(k2, output_size, input_size)   # conv2
    wr, br = lin(k3, output_size, input_size)   # conv_res

    row = lambda v: v.reshape(1, -1)
    return {
        "w1": w1.T.astype(weights_dtype), "b1": row(b1),
        "w2": w2.T.astype(weights_dtype), "b2": row(b2),
        "wr": wr.T.astype(weights_dtype), "br": row(br),
    }


# ----------------------------------------------------------------------------
# Wrapper: grid over batch tiles, weights resident across steps.
# ----------------------------------------------------------------------------
@jax.jit
def linear_res_block_forward(x, params):
    bs, in_dim = x.shape
    out_dim = params["w2"].shape[1]

    tm = bs if bs <= _BLOCK_M else _BLOCK_M
    if tm != bs and tm % 8 != 0:              # (8,128) rule for partial blocks
        tm = max(8, (tm // 8) * 8)
    grid = (pl.cdiv(bs, tm),)

    param_list = [params[k] for k in PARAM_ORDER]

    in_specs = [pl.BlockSpec((tm, in_dim), lambda m: (m, 0))]
    in_specs += [pl.BlockSpec(p.shape, lambda m: (0, 0)) for p in param_list]
    out_specs = pl.BlockSpec((tm, out_dim), lambda m: (m, 0))

    # Explicit VMEM budget: double-buffered x/out tiles + resident weights
    # + slack; keeps the tile sizing inside v7x's 64 MiB VMEM as well.
    tile_bytes = (tm * in_dim + tm * out_dim) * 4
    weight_bytes = sum(int(p.size) * p.dtype.itemsize for p in param_list)
    vmem_bytes = 2 * (tile_bytes + weight_bytes) + (4 << 20)
    vmem_bytes = int(min(max(vmem_bytes, 16 << 20), 48 << 20))

    return pl.pallas_call(
        linear_res_block_kernel,
        out_shape=jax.ShapeDtypeStruct((bs, out_dim), jnp.float32),
        grid_spec=pltpu.PrefetchScalarGridSpec(
            num_scalar_prefetch=0,
            grid=grid,
            in_specs=in_specs,
            out_specs=out_specs,
        ),
        compiler_params=pltpu.CompilerParams(
            dimension_semantics=("parallel",),
            vmem_limit_bytes=vmem_bytes),
    )(x, *param_list)


# ----------------------------------------------------------------------------
# Pure-JAX reference (same math / same dtypes as the kernel).
# ----------------------------------------------------------------------------
def linear_res_block_ref(x, p):
    f32 = jnp.float32
    cdt = p["w1"].dtype
    xr = jnp.maximum(x, 0.0).astype(cdt)
    h = jnp.dot(xr, p["w1"], preferred_element_type=f32) + p["b1"]
    h = jnp.maximum(h, 0.0).astype(cdt)
    out = (jnp.dot(h, p["w2"], preferred_element_type=f32) + p["b2"]
           + jnp.dot(x.astype(cdt), p["wr"], preferred_element_type=f32)
           + p["br"])
    return out


if __name__ == "__main__":
    # Small but MXU/grid friendly: 2 parallel grid steps of 256 rows each.
    bs, in_dim, out_dim = 512, 256, 256

    key = jax.random.PRNGKey(0)
    kx, kp = jax.random.split(key)
    x = jax.random.normal(kx, (bs, in_dim), jnp.float32)

    # --- f32 weights: strict correctness check ---
    p32 = make_params(in_dim, out_dim, kp, jnp.float32)
    y32 = jax.block_until_ready(linear_res_block_forward(x, p32))
    r32 = linear_res_block_ref(x, p32)
    assert y32.shape == (bs, out_dim), y32.shape
    assert jnp.allclose(y32, r32, atol=2e-3, rtol=2e-3)

    # --- bf16 weights / matmul inputs (f32 accumulate): v6e/v7x fast path ---
    pbf = make_params(in_dim, out_dim, kp, jnp.bfloat16)
    ybf = jax.block_until_ready(linear_res_block_forward(x, pbf))
    rbf = linear_res_block_ref(x, pbf)
    assert ybf.shape == (bs, out_dim), ybf.shape
    assert jnp.allclose(ybf, rbf, atol=2e-2, rtol=2e-2)

    print("KERNEL_OK")
</pallas_src>

<mosaic_0001>
module attributes {stable_mosaic.version = 11 : i64} {
  func.func @linear_res_block_kernel(%arg0: i32, %arg1: memref<256x256xf32, #tpu.memory_space<vmem>>, %arg2: memref<256x256xf32, #tpu.memory_space<vmem>>, %arg3: memref<1x256xf32, #tpu.memory_space<vmem>>, %arg4: memref<256x256xf32, #tpu.memory_space<vmem>>, %arg5: memref<1x256xf32, #tpu.memory_space<vmem>>, %arg6: memref<256x256xf32, #tpu.memory_space<vmem>>, %arg7: memref<1x256xf32, #tpu.memory_space<vmem>>, %arg8: memref<256x256xf32, #tpu.memory_space<vmem>>) attributes {dimension_semantics = [#tpu.dimension_semantics<parallel>], iteration_bounds = array<i64: 2>, scalar_prefetch = 0 : i64, scratch_operands = 0 : i64, tpu.core_type = #tpu.core_type<tc>, window_params = [{transform_indices = @transform_0, window_bounds = array<i64: 256, 256>}, {pipeline_mode = #tpu.pipeline_mode<synchronous>, transform_indices = @transform_1, window_bounds = array<i64: 256, 256>}, {pipeline_mode = #tpu.pipeline_mode<synchronous>, transform_indices = @transform_2, window_bounds = array<i64: 1, 256>}, {pipeline_mode = #tpu.pipeline_mode<synchronous>, transform_indices = @transform_3, window_bounds = array<i64: 256, 256>}, {pipeline_mode = #tpu.pipeline_mode<synchronous>, transform_indices = @transform_4, window_bounds = array<i64: 1, 256>}, {pipeline_mode = #tpu.pipeline_mode<synchronous>, transform_indices = @transform_5, window_bounds = array<i64: 256, 256>}, {pipeline_mode = #tpu.pipeline_mode<synchronous>, transform_indices = @transform_6, window_bounds = array<i64: 1, 256>}, {transform_indices = @transform_7, window_bounds = array<i64: 256, 256>}]} {
    %c0 = arith.constant 0 : index
    %c0_0 = arith.constant 0 : index
    %0 = vector.load %arg1[%c0, %c0_0] : memref<256x256xf32, #tpu.memory_space<vmem>>, vector<256x256xf32>
    %cst = arith.constant 0.000000e+00 : f32
    %1 = vector.broadcast %cst : f32 to vector<256x256xf32>
    %2 = arith.maximumf %0, %1 : vector<256x256xf32>
    %c0_1 = arith.constant 0 : index
    %c0_2 = arith.constant 0 : index
    %3 = vector.load %arg2[%c0_1, %c0_2] : memref<256x256xf32, #tpu.memory_space<vmem>>, vector<256x256xf32>
    %cst_3 = arith.constant dense<0.000000e+00> : vector<256x256xf32>
    %4 = tpu.matmul %2, %3, %cst_3 {dimension_numbers = #tpu.dot_dimension_numbers<[1], [0], [0], [1], [0, 0, 1, 1], [], []>} : vector<256x256xf32>, vector<256x256xf32>, vector<256x256xf32> -> vector<256x256xf32>
    %c0_4 = arith.constant 0 : index
    %c0_5 = arith.constant 0 : index
    %5 = vector.load %arg3[%c0_4, %c0_5] : memref<1x256xf32, #tpu.memory_space<vmem>>, vector<1x256xf32>
    %6 = vector.broadcast %5 : vector<1x256xf32> to vector<256x256xf32>
    %7 = arith.addf %4, %6 : vector<256x256xf32>
    %cst_6 = arith.constant 0.000000e+00 : f32
    %8 = vector.broadcast %cst_6 : f32 to vector<256x256xf32>
    %9 = arith.maximumf %7, %8 : vector<256x256xf32>
    %c0_7 = arith.constant 0 : index
    %c0_8 = arith.constant 0 : index
    %10 = vector.load %arg4[%c0_7, %c0_8] : memref<256x256xf32, #tpu.memory_space<vmem>>, vector<256x256xf32>
    %cst_9 = arith.constant dense<0.000000e+00> : vector<256x256xf32>
    %11 = tpu.matmul %9, %10, %cst_9 {dimension_numbers = #tpu.dot_dimension_numbers<[1], [0], [0], [1], [0, 0, 1, 1], [], []>} : vector<256x256xf32>, vector<256x256xf32>, vector<256x256xf32> -> vector<256x256xf32>
    %c0_10 = arith.constant 0 : index
    %c0_11 = arith.constant 0 : index
    %12 = vector.load %arg5[%c0_10, %c0_11] : memref<1x256xf32, #tpu.memory_space<vmem>>, vector<1x256xf32>
    %13 = vector.broadcast %12 : vector<1x256xf32> to vector<256x256xf32>
    %14 = arith.addf %11, %13 : vector<256x256xf32>
    %c0_12 = arith.constant 0 : index
    %c0_13 = arith.constant 0 : index
    %15 = vector.load %arg6[%c0_12, %c0_13] : memref<256x256xf32, #tpu.memory_space<vmem>>, vector<256x256xf32>
    %cst_14 = arith.constant dense<0.000000e+00> : vector<256x256xf32>
    %16 = tpu.matmul %0, %15, %cst_14 {dimension_numbers = #tpu.dot_dimension_numbers<[1], [0], [0], [1], [0, 0, 1, 1], [], []>} : vector<256x256xf32>, vector<256x256xf32>, vector<256x256xf32> -> vector<256x256xf32>
    %17 = arith.addf %14, %16 : vector<256x256xf32>
    %c0_15 = arith.constant 0 : index
    %c0_16 = arith.constant 0 : index
    %18 = vector.load %arg7[%c0_15, %c0_16] : memref<1x256xf32, #tpu.memory_space<vmem>>, vector<1x256xf32>
    %19 = vector.broadcast %18 : vector<1x256xf32> to vector<256x256xf32>
    %20 = arith.addf %17, %19 : vector<256x256xf32>
    %c0_17 = arith.constant 0 : index
    %c0_18 = arith.constant 0 : index
    %21 = vector.load %arg8[%c0_17, %c0_18] : memref<256x256xf32, #tpu.memory_space<vmem>>, vector<256x256xf32>
    tpu.vector_store %arg8[%c0_17, %c0_18], %20 {strides = array<i32>} : memref<256x256xf32, #tpu.memory_space<vmem>>, vector<256x256xf32>,
    return
  }
  func.func @transform_0(%arg0: i32) -> (i32, i32) {
    %c0_i32 = arith.constant 0 : i32
    %c0_i32_0 = arith.constant 0 : i32
    return %arg0, %c0_i32 : i32, i32
  }
  func.func @transform_1(%arg0: i32) -> (i32, i32) {
    %c0_i32 = arith.constant 0 : i32
    %c0_i32_0 = arith.constant 0 : i32
    %c0_i32_1 = arith.constant 0 : i32
    return %c0_i32, %c0_i32_0 : i32, i32
  }
  func.func @transform_2(%arg0: i32) -> (i32, i32) {
    %c0_i32 = arith.constant 0 : i32
    %c0_i32_0 = arith.constant 0 : i32
    %c0_i32_1 = arith.constant 0 : i32
    return %c0_i32, %c0_i32_0 : i32, i32
  }
  func.func @transform_3(%arg0: i32) -> (i32, i32) {
    %c0_i32 = arith.constant 0 : i32
    %c0_i32_0 = arith.constant 0 : i32
    %c0_i32_1 = arith.constant 0 : i32
    return %c0_i32, %c0_i32_0 : i32, i32
  }
  func.func @transform_4(%arg0: i32) -> (i32, i32) {
    %c0_i32 = arith.constant 0 : i32
    %c0_i32_0 = arith.constant 0 : i32
    %c0_i32_1 = arith.constant 0 : i32
    return %c0_i32, %c0_i32_0 : i32, i32
  }
  func.func @transform_5(%arg0: i32) -> (i32, i32) {
    %c0_i32 = arith.constant 0 : i32
    %c0_i32_0 = arith.constant 0 : i32
    %c0_i32_1 = arith.constant 0 : i32
    return %c0_i32, %c0_i32_0 : i32, i32
  }
  func.func @transform_6(%arg0: i32) -> (i32, i32) {
    %c0_i32 = arith.constant 0 : i32
    %c0_i32_0 = arith.constant 0 : i32
    %c0_i32_1 = arith.constant 0 : i32
    return %c0_i32, %c0_i32_0 : i32, i32
  }
  func.func @transform_7(%arg0: i32) -> (i32, i32) {
    %c0_i32 = arith.constant 0 : i32
    %c0_i32_0 = arith.constant 0 : i32
    return %arg0, %c0_i32 : i32, i32
  }
}

</mosaic_0001>

<bundles_post_ra>
// kernel: linear_res_block_forward.1
= control target key start
LH: loop header
LB: loop body
LE: loop exit
PB: predicated region body
PF: predicated region fallthrough
CT: control target
= control target key end

     0   :  { %s3348_s0 = inlined_call_operand.hbm [shape: f32[512,256], index: 0, kind: input, shape index: {}]   ;;  %s3349_s1 = inlined_call_operand.hbm [shape: f32[256,256], index: 1, kind: input, shape index: {}]   ;;  %s3350_s2 = inlined_call_operand.hbm [shape: f32[1,256], index: 2, kind: input, shape index: {}]   ;;  %s3351_s3 = inlined_call_operand.hbm [shape: f32[256,256], index: 3, kind: input, shape index: {}]   ;;  %s3352_s4 = inlined_call_operand.vmem [shape: f32[1,256], index: 4, kind: input, shape index: {}]   ;;  %s3353_s5 = inlined_call_operand.hbm [shape: f32[256,256], index: 5, kind: input, shape index: {}]   ;;  %s3354_s6 = inlined_call_operand.vmem [shape: f32[1,256], index: 6, kind: input, shape index: {}]   ;;  %s3355_s7 = inlined_call_operand.hbm [shape: f32[512,256], index: 7, kind: output, shape index: {}]  }
   0x1   :  { %3377 = sst [smem:[#allocation31_spill]] %s3349_s1 }
   0x2   :  { %12 = vsyncpa [#allocation3], 0 }
   0x3   :  { %14 = vsyncpa [#allocation3 + $0x1], 0 }
   0x4   :  { %15 = vsyncpa [#allocation6], 0 }
   0x5   :  { %16 = vsyncpa [#allocation9], 0 }
   0x6   :  { %17 = vsyncpa [#allocation4], 0 }
   0x7   :  { %19 = vsyncpa [#allocation4 + $0x1], 0  ;;  %s2305_s24 = smov 0   ;;  %s2307_s25 = smov 0  }
   0x8   :  { %s2309_s26 = smov 0   ;;  %s2311_s27 = smov 0  }
   0x9 LB: > { %s2326_s28 = sadd.s32 4294967295, %s2253_s27   ;;  %s1865_s29 = sadd.s32 4294967294, %s2253_s27   ;;  %s2253_s27 = sphi %s2311_s27, %s3430_s27   ;;  %s2249_s26 = sphi %s2309_s26, %s3429_s26   ;;  %s2245_s25 = sphi %s2307_s25, %s3428_s25   ;;  %s2241_s24 = sphi %s2305_s24, %s3427_s24  }
   0xa   : > { %p45_p0 = scmp.ne.s32.totalorder %s2245_s25, %s2241_s24  ;;  %p3356_p1 = scmp.eq.s32.totalorder %s2326_s28, 0 }
   0xb   : > { %p201_p3 = scmp.eq.s32.totalorder %s1865_s29, 1  ;;  %p1866_p5 = scmp.ge.s32.totalorder %s2253_s27, 1 }
   0xc   : > { %p2335_p4 = por %p3356_p1, %p45_p0  ;;  %p208_p7 = scmp.lt.s32.totalorder %s2253_s27, 3 }
   0xd   : > { %p2340_p6 = por %p201_p3, %p45_p0  ;;  %s2255_s10 = smov [#allocation5]  }
   0xe   : > { %s3378_s30 = scalar_select %p2335_p4, 1, 0 }
   0xf   : > { %s3379_s8 = scalar_select %p2340_p6, 1, 0 }
  0x10   : > { %p2345_p8 = pnand %p1866_p5, %p208_p7  ;;  %s220_s11 = sshll.u32 %s2255_s10, 4  ;;  %s221_s11 = int_to_ptr.vmem [resolvable:$true] %s220_s11 }
  0x11   : > { %s2256_s13 = smov [#allocation8]   ;;  %s2257_s15 = smov [#allocation7]  }
  0x12   : > { %s3380_s9 = scalar_select %p2345_p8, 1, 0 }
  0x13   : > { %p1977_p9 = pneg %p2345_p8  ;;  %s244_s14 = sshll.u32 %s2256_s13, 4  ;;  %s245_s14 = int_to_ptr.vmem [resolvable:$true] %s244_s14 }
  0x14   : > { %s234_s16 = sshll.u32 %s2257_s15, 4  ;;  %s2060_s17 = scalar_lea.vmem %s221_s11, 8192  ;;  %s235_s16 = int_to_ptr.vmem [resolvable:$true] %s234_s16 }
  0x15   : > { %p2354_p11 = pnand %p1977_p9, %p3356_p1  ;;  %p2061_p13 = scmp.ne.s32.totalorder %s221_s11, %s2060_s17 }
  0x16   : > { %p2068_p5 = scmp.lt.s32.totalorder %s221_s11, %s221_s11  ;;  %p2069_p7 = scmp.lt.s32.totalorder %s2060_s17, %s2060_s17 }
  0x17   : > { %p2051_p12 = pneg %p2354_p11 }
  0x18   : > { %p2070_p9 = por %p2069_p7, %p2068_p5 }
  0x19   : > { %p2063_p0 = pnand %p2061_p13, %p2051_p12 }
  0x1b   : > { %p2064_p3 = pneg %p2063_p0 }
  0x1d   : > { %p2071_p10 = pnand %p2070_p9, %p2064_p3 }
  0x1f   : > { %2074 = shalt.err (!%p2071_p10)
}
  0x20   : > { %s3357_s18 = smov 256   ;;  %s3358_s19 = smov 16  }
  0x21   : > { %s3382_s1 = sld [smem:[#allocation31_spill]]  ;;  %s2086_s22 = scalar_lea.vmem %s245_s14, 8192 }
  0x22   : > { %p2087_p13 = scmp.ne.s32.totalorder %s245_s14, %s2086_s22  ;;  %p2094_p3 = scmp.lt.s32.totalorder %s245_s14, %s245_s14 }
  0x23   : > { %p2095_p10 = scmp.lt.s32.totalorder %s2086_s22, %s2086_s22 }
  0x24   : > { %p2089_p0 = pnand %p2087_p13, %p2051_p12 }
  0x25   : > { %p2096_p7 = por %p2095_p10, %p2094_p3 }
  0x26   : > { %p2090_p5 = pneg %p2089_p0 }
  0x27   : > { %1980 = dma.hbm_to_vmem [thread:$0]  (!%p2354_p11), %s3382_s1, 8192, %s221_s11, [#allocation6], %s3357_s18, %s3357_s18, %s3358_s19  }
  0x28   : > { %p2097_p9 = pnand %p2096_p7, %p2090_p5 }
  0x2a   : > { %2100 = shalt.err (!%p2097_p9)
}
  0x2b   : > { %1986 = dma.hbm_to_vmem [thread:$0]  (!%p2354_p11), %s3351_s3, 8192, %s245_s14, [#allocation9], %s3357_s18, %s3357_s18, %s3358_s19  }
  0x2c   : > { %s2112_s10 = scalar_lea.vmem %s235_s16, 32  ;;  %p2120_p3 = scmp.lt.s32.totalorder %s235_s16, %s235_s16 }
  0x2d   : > { %p2113_p1 = scmp.ne.s32.totalorder %s235_s16, %s2112_s10  ;;  %p2121_p5 = scmp.lt.s32.totalorder %s2112_s10, %s2112_s10 }
  0x2f   : > { %p2115_p13 = pnand %p2113_p1, %p2051_p12  ;;  %p2122_p10 = por %p2121_p5, %p2120_p3 }
  0x31   : > { %p2116_p0 = pneg %p2115_p13 }
  0x33   : > { %p2123_p7 = pnand %p2122_p10, %p2116_p0 }
  0x35   : > { %2126 = shalt.err (!%p2123_p7)
}
  0x36   : > { %1983 = dma.hbm_to_vmem [thread:$0]  (!%p2354_p11), %s3350_s2, 32, %s235_s16, [#allocation6]  }
  0x37   : > { %s2260_s14 = smov [#allocation10]  }
  0x38   : > { %s260_s15 = sshll.u32 %s2260_s14, 4  ;;  %s261_s15 = int_to_ptr.vmem [resolvable:$true] %s260_s15 }
  0x39   : > { %s2138_s17 = scalar_lea.vmem %s261_s15, 8192  ;;  %p2146_p2 = scmp.lt.s32.totalorder %s261_s15, %s261_s15 }
  0x3a   : > { %p2139_p9 = scmp.ne.s32.totalorder %s261_s15, %s2138_s17  ;;  %p2147_p3 = scmp.lt.s32.totalorder %s2138_s17, %s2138_s17 }
  0x3c   : > { %p2141_p1 = pnand %p2139_p9, %p2051_p12  ;;  %p2148_p0 = por %p2147_p3, %p2146_p2 }
  0x3e   : > { %p2142_p13 = pneg %p2141_p1 }
  0x40   : > { %p2149_p5 = pnand %p2148_p0, %p2142_p13 }
  0x42   : > { %2152 = shalt.err (!%p2149_p5)
}
  0x43   : > { %1989 = dma.hbm_to_vmem [thread:$0]  (!%p2354_p11), %s3353_s5, 8192, %s261_s15, [#allocation9], %s3357_s18, %s3357_s18, %s3358_s19  }
  0x44   : > { %s2402_s21 = sadd.s32 1, %s2253_s27   ;;  %s32_s12 = sadd.s32 1, %s2249_s26 }
  0x45   : > { %s29_s22 = ssub.s32 %s2253_s27, %s2402_s21  ;;  %p39_p2 = scmp.ne.s32.totalorder %s2249_s26, %s2245_s25 }
  0x46   : > { %p30_p12 = scmp.eq.s32.totalorder %s29_s22, 0  ;;  %p40_p10 = scmp.eq.s32.totalorder %s2253_s27, 0 }
  0x47   : > { %p3383_p7 = scmp.eq.s32.totalorder %s2326_s28, 1  ;;  %p2002_p1 = scmp.lt.s32.totalorder %s2253_s27, 2 }
  0x48   : > { %s2418_s29 = scalar_select %p30_p12, %s2249_s26, %s32_s12  }
  0x49   : > { %p2412_p9 = por %p3383_p7, %p39_p2  ;;  %p41_p13 = por %p40_p10, %p39_p2 }
  0x4a   : > { %s277_s10 = sand.u32 1, %s2249_s26   ;;  %s1890_s13 = sshll.u32 %s2253_s27, 13 }
  0x4b   : > { %s3384_s23 = scalar_select %p2412_p9, 1, 0 }
  0x4c   : > { %s1872_s11 = sshll.u32 %s277_s10, 9  ;;  %s2425_s17 = scalar_lea.hbm %s3348_s0, %s1890_s13 }
  0x4d   : > { %s281_s16 = scalar_lea.vmem [#allocation2], %s1872_s11  ;;  %p2429_p11 = pnand %p2002_p1, %p41_p13 }
  0x4e   : > { %s289_s20 = sshll.u32 %s281_s16, 4  ;;  %s2433_s12 = scalar_lea.sflag [#allocation3], %s277_s10  ;;  %s2427_s20 = int_to_ptr.vmem [resolvable:$true] %s289_s20 }
  0x4f   : > { %s2153_s18 = scalar_lea.hbm %s2425_s17, 8192  ;;  %p2155_p0 = pneg %p2429_p11 }
  0x50   : > { %p2154_p3 = scmp.ne.s32.totalorder %s2425_s17, %s2153_s18  ;;  %s2158_s11 = scalar_lea.hbm %s3348_s0, 16384 }
  0x51   : > { %p2159_p12 = scmp.lt.s32.totalorder %s2425_s17, %s3348_s0  ;;  %p2160_p10 = scmp.lt.s32.totalorder %s2158_s11, %s2153_s18 }
  0x52   : > { %p2156_p5 = pnand %p2155_p0, %p2154_p3 }
  0x53   : > { %p2161_p7 = por %p2160_p10, %p2159_p12 }
  0x54   : > { %p2157_p2 = pneg %p2156_p5 }
  0x56   : > { %p2162_p1 = pnand %p2161_p7, %p2157_p2 }
  0x58   : > { %2165 = shalt.err (!%p2162_p1)
}
  0x59   : > { %s2166_s10 = scalar_lea.vmem %s2427_s20, 8192  ;;  %s2261_s19 = smov [#allocation2]  }
  0x5a   : > { %p2167_p13 = scmp.ne.s32.totalorder %s2427_s20, %s2166_s10  ;;  %s2171_s1 = sshll.u32 %s2261_s19, 4  ;;  %s2172_s1 = int_to_ptr.vmem [resolvable:$false] %s2171_s1 }
  0x5b   : > { %s2173_s13 = scalar_lea.vmem %s2172_s1, 16384  ;;  %p2174_p5 = scmp.lt.s32.totalorder %s2427_s20, %s2172_s1 }
  0x5c   : > { %p2169_p6 = pnand %p2167_p13, %p2155_p0  ;;  %p2175_p9 = scmp.lt.s32.totalorder %s2173_s13, %s2166_s10 }
  0x5e   : > { %p2170_p3 = pneg %p2169_p6  ;;  %p2176_p4 = por %p2175_p9, %p2174_p5 }
  0x60   : > { %p2177_p8 = pnand %p2176_p4, %p2170_p3 }
  0x62   : > { %2180 = shalt.err (!%p2177_p8)
}
  0x63   : > { %s3386_s18 = smov 16   ;;  %s3387_s14 = smov 256  }
  0x64   : > { %1993 = dma.hbm_to_vmem [thread:$0]  (!%p2429_p11), %s2425_s17, 8192, %s2427_s20, %s2433_s12, %s3387_s14, %s3387_s14, %s3386_s18  }
  0x65   : > { %p3388_p6 = scmp.ne.s32.totalorder %s3380_s9, 0 }
  0x67   : > { %301 = sbr.rel (%p3388_p6) target bundleno = 722 (0x2d2), region = 48 }
  0x6c   : > { %s2460_s19 = sand.u32 1, %s2245_s25   ;;  %p3389_p4 = scmp.ne.s32.totalorder %s3378_s30, 0 }
  0x6d   : > { %s1877_s1 = sshll.u32 %s2460_s19, 9  ;;  %s304_s11 = scalar_lea.sflag [#allocation3], %s2460_s19 }
  0x6e   : > { %s2466_s22 = scalar_lea.vmem [#allocation2], %s1877_s1 }
  0x6f   : > { %2224 = dma.done.wait (%p3389_p4), %s304_s11, 8192  }
  0x70   : > { %2226 = vsyncadd (%p3389_p4), %s304_s11, 4294959104  ;;  %p3390_p8 = scmp.eq.s32.totalorder %s2326_s28, 0 }
  0x72   : > { %2228 = dma.done.wait (%p3390_p8), [#allocation6], 8224   ;;  %p3391_p9 = pmov %p3390_p8 }
  0x73   : > { %p3392_p11 = pmov %p3390_p8 }
  0x74   : > { %2230 = vsyncadd (%p3391_p9), [#allocation6], 4294959072 }
  0x75   : > { %2232 = dma.done.wait (%p3392_p11), [#allocation9], 16384   ;;  %p3393_p0 = pmov %p3390_p8 }
  0x76   : > { %v515_v0 = vld [vmem:[#allocation5 + $0xf8] sm:$0xff]  ;;  %v514_v1 = vld [vmem:[#allocation5 + $0xf0] sm:$0xff]  ;;  %v513_v2 = vld [vmem:[#allocation5 + $0xe8] sm:$0xff]  ;;  %s3017_s12 = scalar_lea.vmem [#allocation11], %s1877_s1  ;;  %s1892_s15 = sshll.u32 %s2326_s28, 13 }
  0x77   : > { %2234 = vsyncadd (%p3393_p0), [#allocation9], 4294950912  ;;  %560 = vmatprep.subr.mxu0 %v515_v0  ;;  %v512_v3 = vld [vmem:[#allocation5 + $0xe0] sm:$0xff]  ;;  %1893 = vmatprep.subr.mxu1 %v515_v0  ;;  %v511_v4 = vld [vmem:[#allocation5 + $0xd8] sm:$0xff]  ;;  %s1754_s16 = sshll.u32 %s3017_s12, 4  ;;  %s3300_s18 = scalar_lea.hbm %s3355_s7, %s1892_s15  ;;  %s3302_s16 = int_to_ptr.vmem [resolvable:$true] %s1754_s16 }
  0x78   : > { %561 = vmatpush1.msra.mxu0 %v514_v1  ;;  %1925 = vmatpush1.msra.mxu1 %v514_v1  ;;  %v510_v5 = vld [vmem:[#allocation5 + $0xd0] sm:$0xff]  ;;  %v509_v6 = vld [vmem:[#allocation5 + $0xc8] sm:$0xff]  ;;  %v508_v7 = vld [vmem:[#allocation5 + $0xc0] sm:$0xff]  ;;  %s1740_s28 = scalar_lea.sflag [#allocation4], %s2460_s19  ;;  %s2181_s14 = scalar_lea.vmem %s3302_s16, 8192 }
  0x79   : > { %562 = vmatprep.subr.mxu0 %v513_v2  ;;  %1894 = vmatprep.subr.mxu1 %v513_v2  ;;  %v507_v8 = vld [vmem:[#allocation5 + $0xb8] sm:$0xff]  ;;  %v506_v9 = vld [vmem:[#allocation5 + $0xb0] sm:$0xff]  ;;  %v505_v10 = vld [vmem:[#allocation5 + $0xa8] sm:$0xff]  ;;  %p2182_p2 = scmp.ne.s32.totalorder %s3302_s16, %s2181_s14  ;;  %p3424_p12 = scmp.ne.s32.totalorder %s3384_s23, 0 }
  0x7a   : > { %563 = vmatpush1.msra.mxu0 %v512_v3  ;;  %1926 = vmatpush1.msra.mxu1 %v512_v3  ;;  %v504_v11 = vld [vmem:[#allocation5 + $0xa0] sm:$0xff]  ;;  %v503_v12 = vld [vmem:[#allocation5 + $0x98] sm:$0xff]  ;;  %v502_v13 = vld [vmem:[#allocation5 + $0x90] sm:$0xff]  ;;  %s2262_s1 = smov [#allocation11]  }
  0x7b   : > { %564 = vmatprep.subr.mxu0 %v511_v4  ;;  %1895 = vmatprep.subr.mxu1 %v511_v4  ;;  %v501_v14 = vld [vmem:[#allocation5 + $0x88] sm:$0xff]  ;;  %v500_v15 = vld [vmem:[#allocation5 + $0x80] sm:$0xff]  ;;  %v499_v16 = vld [vmem:[#allocation5 + $0x78] sm:$0xff]  ;;  %p2183_p10 = pnand %p2182_p2, %p3424_p12  ;;  %s2185_s11 = sshll.u32 %s2262_s1, 4  ;;  %s2186_s11 = int_to_ptr.vmem [resolvable:$false] %s2185_s11 }
  0x7c   : > { %565 = vmatpush1.msra.mxu0 %v510_v5  ;;  %1927 = vmatpush1.msra.mxu1 %v510_v5  ;;  %v498_v17 = vld [vmem:[#allocation5 + $0x70] sm:$0xff]  ;;  %v497_v18 = vld [vmem:[#allocation5 + $0x68] sm:$0xff]  ;;  %v496_v19 = vld [vmem:[#allocation5 + $0x60] sm:$0xff]  ;;  %p2188_p1 = scmp.lt.s32.totalorder %s3302_s16, %s2186_s11 }
  0x7d   : > { %566 = vmatprep.subr.mxu0 %v509_v6  ;;  %1896 = vmatprep.subr.mxu1 %v509_v6  ;;  %v495_v20 = vld [vmem:[#allocation5 + $0x58] sm:$0xff]  ;;  %v494_v21 = vld [vmem:[#allocation5 + $0x50] sm:$0xff]  ;;  %v493_v22 = vld [vmem:[#allocation5 + $0x48] sm:$0xff]  ;;  %p2184_p7 = pneg %p2183_p10 }
  0x7e   : > { %567 = vmatpush1.msra.mxu0 %v508_v7  ;;  %1928 = vmatpush1.msra.mxu1 %v508_v7  ;;  %v492_v23 = vld [vmem:[#allocation5 + $0x40] sm:$0xff]  ;;  %v357_v24 = vld [vmem:[%s2466_s22 + $0x8] sm:$0xff]  ;;  %v491_v25 = vld [vmem:[#allocation5 + $0x38] sm:$0xff] }
  0x7f   : > { %568 = vmatprep.subr.mxu0 %v507_v8  ;;  %1897 = vmatprep.subr.mxu1 %v507_v8  ;;  %v421_v26 = vmax.f32 %v357_v24, 0.0  ;;  %v490_v27 = vld [vmem:[#allocation5 + $0x30] sm:$0xff]  ;;  %v489_v28 = vld [vmem:[#allocation5 + $0x28] sm:$0xff]  ;;  %v488_v29 = vld [vmem:[#allocation5 + $0x20] sm:$0xff] }
  0x80   : > { %569 = vmatpush1.msra.mxu0 %v506_v9  ;;  %1929 = vmatpush1.msra.mxu1 %v506_v9  ;;  %v487_v30 = vld [vmem:[#allocation5 + $0x18] sm:$0xff]  ;;  %v486_v31 = vld [vmem:[#allocation5 + $0x10] sm:$0xff]  ;;  %v485_v32 = vld [vmem:[#allocation5 + $0x8] sm:$0xff] }
  0x81   : > { %570 = vmatprep.subr.mxu0 %v505_v10  ;;  %1898 = vmatprep.subr.mxu1 %v505_v10  ;;  %v484_v33 = vld [vmem:[#allocation5] sm:$0xff]  ;;  %v547_v34 = vld [vmem:[#allocation5 + $0x1f8] sm:$0xff]  ;;  %v546_v35 = vld [vmem:[#allocation5 + $0x1f0] sm:$0xff] }
  0x82   : > { %571 = vmatpush1.msra.mxu0 %v504_v11  ;;  %1930 = vmatpush1.msra.mxu1 %v504_v11  ;;  %v545_v36 = vld [vmem:[#allocation5 + $0x1e8] sm:$0xff]  ;;  %v544_v37 = vld [vmem:[#allocation5 + $0x1e0] sm:$0xff]  ;;  %v543_v38 = vld [vmem:[#allocation5 + $0x1d8] sm:$0xff] }
  0x83   : > { %572 = vmatprep.subr.mxu0 %v503_v12  ;;  %1899 = vmatprep.subr.mxu1 %v503_v12  ;;  %v542_v39 = vld [vmem:[#allocation5 + $0x1d0] sm:$0xff]  ;;  %v541_v40 = vld [vmem:[#allocation5 + $0x1c8] sm:$0xff]  ;;  %v540_v41 = vld [vmem:[#allocation5 + $0x1c0] sm:$0xff] }
  0x84   : > { %573 = vmatpush1.msra.mxu0 %v502_v13  ;;  %1931 = vmatpush1.msra.mxu1 %v502_v13  ;;  %v539_v42 = vld [vmem:[#allocation5 + $0x1b8] sm:$0xff]  ;;  %v538_v43 = vld [vmem:[#allocation5 + $0x1b0] sm:$0xff]  ;;  %v537_v44 = vld [vmem:[#allocation5 + $0x1a8] sm:$0xff] }
  0x85   : > { %574 = vmatprep.subr.mxu0 %v501_v14  ;;  %1900 = vmatprep.subr.mxu1 %v501_v14  ;;  %v536_v45 = vld [vmem:[#allocation5 + $0x1a0] sm:$0xff]  ;;  %v535_v46 = vld [vmem:[#allocation5 + $0x198] sm:$0xff]  ;;  %v534_v47 = vld [vmem:[#allocation5 + $0x190] sm:$0xff] }
  0x86   : > { %575 = vmatpush1.msra.mxu0 %v500_v15  ;;  %1932 = vmatpush1.msra.mxu1 %v500_v15  ;;  %v533_v48 = vld [vmem:[#allocation5 + $0x188] sm:$0xff]  ;;  %v532_v49 = vld [vmem:[#allocation5 + $0x180] sm:$0xff]  ;;  %v531_v50 = vld [vmem:[#allocation5 + $0x178] sm:$0xff] }
  0x87   : > { %576 = vmatprep.subr.mxu0 %v499_v16  ;;  %1901 = vmatprep.subr.mxu1 %v499_v16  ;;  %v530_v51 = vld [vmem:[#allocation5 + $0x170] sm:$0xff]  ;;  %v529_v52 = vld [vmem:[#allocation5 + $0x168] sm:$0xff]  ;;  %v528_v53 = vld [vmem:[#allocation5 + $0x160] sm:$0xff] }
  0x88   : > { %577 = vmatpush1.msra.mxu0 %v498_v17  ;;  %1933 = vmatpush1.msra.mxu1 %v498_v17  ;;  %v527_v54 = vld [vmem:[#allocation5 + $0x158] sm:$0xff]  ;;  %v526_v55 = vld [vmem:[#allocation5 + $0x150] sm:$0xff]  ;;  %v525_v56 = vld [vmem:[#allocation5 + $0x148] sm:$0xff] }
  0x89   : > { %578 = vmatprep.subr.mxu0 %v497_v18  ;;  %1902 = vmatprep.subr.mxu1 %v497_v18  ;;  %v524_v57 = vld [vmem:[#allocation5 + $0x140] sm:$0xff]  ;;  %v523_v58 = vld [vmem:[#allocation5 + $0x138] sm:$0xff]  ;;  %v522_v59 = vld [vmem:[#allocation5 + $0x130] sm:$0xff] }
  0x8a   : > { %579 = vmatpush1.msra.mxu0 %v496_v19  ;;  %1934 = vmatpush1.msra.mxu1 %v496_v19  ;;  %v521_v60 = vld [vmem:[#allocation5 + $0x128] sm:$0xff]  ;;  %v520_v61 = vld [vmem:[#allocation5 + $0x120] sm:$0xff]  ;;  %v519_v62 = vld [vmem:[#allocation5 + $0x118] sm:$0xff] }
  0x8b   : > { %580 = vmatprep.subr.mxu0 %v495_v20  ;;  %1903 = vmatprep.subr.mxu1 %v495_v20  ;;  %v2482_v63 = vld [vmem:[%s2466_s22] sm:$0xff]  ;;  %v518_v0 = vld [vmem:[#allocation5 + $0x110] sm:$0xff]  ;;  %v2485_v1 = vld [vmem:[%s2466_s22 + $0x18] sm:$0xff] }
  0x8c   : > { %581 = vmatpush1.msra.mxu0 %v494_v21  ;;  %1935 = vmatpush1.msra.mxu1 %v494_v21  ;;  %v2488_v2 = vld [vmem:[%s2466_s22 + $0x108] sm:$0xff]  ;;  %v2491_v4 = vld [vmem:[%s2466_s22 + $0x100] sm:$0xff]  ;;  %v420_v6 = vmax.f32 %v2482_v63, 0.0  ;;  %v2495_v7 = vld [vmem:[%s2466_s22 + $0x118] sm:$0xff]  ;;  %v423_v8 = vmax.f32 %v2485_v1, 0.0 }
  0x8d   : > { %582 = vmatprep.subr.mxu0 %v493_v22  ;;  %1904 = vmatprep.subr.mxu1 %v493_v22  ;;  %v517_v3 = vld [vmem:[#allocation5 + $0x108] sm:$0xff]  ;;  %v516_v5 = vld [vmem:[#allocation5 + $0x100] sm:$0xff]  ;;  %v2499_v9 = vld [vmem:[%s2466_s22 + $0x10] sm:$0xff]  ;;  %v453_v10 = vmax.f32 %v2488_v2, 0.0  ;;  %v452_v12 = vmax.f32 %v2491_v4, 0.0  ;;  %v455_v13 = vmax.f32 %v2495_v7, 0.0 }
  0x8e   : > { %583 = vmatpush1.msra.mxu0 %v492_v23  ;;  %624 = vmatprep.mubr.f32.mxu0 %v421_v26  ;;  %v2503_v11 = vld [vmem:[%s2466_s22 + $0x28] sm:$0xff]  ;;  %v2508_v14 = vld [vmem:[%s2466_s22 + $0x110] sm:$0xff]  ;;  %v912_v15 = vld [vmem:[#allocation8 + $0xf8] sm:$0xff]  ;;  %v422_v16 = vmax.f32 %v2499_v9, 0.0 }
  0x8f   : > { %584 = vmatprep.subr.mxu0 %v491_v25  ;;  %1936 = vmatpush1.msra.mxu1 %v492_v23  ;;  %v2512_v17 = vld [vmem:[%s2466_s22 + $0x128] sm:$0xff]  ;;  %v911_v18 = vld [vmem:[#allocation8 + $0xf0] sm:$0xff]  ;;  %v425_v19 = vmax.f32 %v2503_v11, 0.0  ;;  %v2516_v20 = vld [vmem:[%s2466_s22 + $0x20] sm:$0xff]  ;;  %v454_v23 = vmax.f32 %v2508_v14, 0.0 }
  0x90   : > { %585 = vmatpush1.msra.mxu0 %v490_v27  ;;  %1905 = vmatprep.subr.mxu1 %v491_v25  ;;  %v1245_v21 = vld [vmem:[#allocation10 + $0xf8] sm:$0xff]  ;;  %v910_v24 = vld [vmem:[#allocation8 + $0xe8] sm:$0xff]  ;;  %v457_v25 = vmax.f32 %v2512_v17, 0.0 }
  0x91   : > { %586 = vmatprep.subr.mxu0 %v489_v28  ;;  %1937 = vmatpush1.msra.mxu1 %v490_v27  ;;  %v2519_v22 = vld [vmem:[%s2466_s22 + $0x38] sm:$0xff]  ;;  %v2524_v26 = vld [vmem:[%s2466_s22 + $0x120] sm:$0xff] }
  0x92   : > { %587 = vmatpush1.msra.mxu0 %v488_v29  ;;  %1906 = vmatprep.subr.mxu1 %v489_v28  ;;  %v1244_v27 = vld [vmem:[#allocation10 + $0xf0] sm:$0xff]  ;;  %v424_v28 = vmax.f32 %v2516_v20, 0.0 }
  0x93   : > { %588 = vmatprep.subr.mxu0 %v487_v30  ;;  %1938 = vmatpush1.msra.mxu1 %v488_v29  ;;  %v2528_v29 = vld [vmem:[%s2466_s22 + $0x138] sm:$0xff] }
  0x94   : > { %589 = vmatpush1.msra.mxu0 %v486_v31  ;;  %1907 = vmatprep.subr.mxu1 %v487_v30  ;;  %v909_v30 = vld [vmem:[#allocation8 + $0xe0] sm:$0xff] }
  0x95   : > { %590 = vmatprep.subr.mxu0 %v485_v32  ;;  %1939 = vmatpush1.msra.mxu1 %v486_v31  ;;  %v427_v31 = vmax.f32 %v2519_v22, 0.0 }
  0x96   : > { %591 = vmatpush1.msra.mxu0 %v484_v33  ;;  %1908 = vmatprep.subr.mxu1 %v485_v32  ;;  %v2532_v32 = vld [vmem:[%s2466_s22 + $0x30] sm:$0xff] }
  0x97   : > { %592 = vmatprep.subr.mxu0 %v547_v34  ;;  %1940 = vmatpush1.msra.mxu1 %v484_v33  ;;  %v1243_v33 = vld [vmem:[#allocation10 + $0xe8] sm:$0xff] }
  0x98   : > { %593 = vmatpush2.msra.mxu0 %v546_v35  ;;  %1909 = vmatprep.subr.mxu1 %v547_v34  ;;  %v2535_v34 = vld [vmem:[%s2466_s22 + $0x48] sm:$0xff] }
  0x99   : > { %594 = vmatprep.subr.mxu0 %v545_v36  ;;  %1941 = vmatpush2.msra.mxu1 %v546_v35  ;;  %v456_v35 = vmax.f32 %v2524_v26, 0.0 }
  0x9a   : > { %595 = vmatpush2.msra.mxu0 %v544_v37  ;;  %1910 = vmatprep.subr.mxu1 %v545_v36  ;;  %v908_v36 = vld [vmem:[#allocation8 + $0xd8] sm:$0xff] }
  0x9b   : > { %596 = vmatprep.subr.mxu0 %v543_v38  ;;  %1942 = vmatpush2.msra.mxu1 %v544_v37  ;;  %v459_v37 = vmax.f32 %v2528_v29, 0.0 }
  0x9c   : > { %597 = vmatpush2.msra.mxu0 %v542_v39  ;;  %1911 = vmatprep.subr.mxu1 %v543_v38  ;;  %v2540_v38 = vld [vmem:[%s2466_s22 + $0x130] sm:$0xff] }
  0x9d   : > { %598 = vmatprep.subr.mxu0 %v541_v40  ;;  %1943 = vmatpush2.msra.mxu1 %v542_v39  ;;  %v1242_v39 = vld [vmem:[#allocation10 + $0xe0] sm:$0xff] }
  0x9e   : > { %599 = vmatpush2.msra.mxu0 %v540_v41  ;;  %1912 = vmatprep.subr.mxu1 %v541_v40  ;;  %v426_v40 = vmax.f32 %v2532_v32, 0.0 }
  0x9f   : > { %600 = vmatprep.subr.mxu0 %v539_v42  ;;  %1944 = vmatpush2.msra.mxu1 %v540_v41  ;;  %v2544_v41 = vld [vmem:[%s2466_s22 + $0x148] sm:$0xff] }
  0xa0   : > { %601 = vmatpush2.msra.mxu0 %v538_v43  ;;  %1913 = vmatprep.subr.mxu1 %v539_v42  ;;  %v907_v42 = vld [vmem:[#allocation8 + $0xd0] sm:$0xff] }
  0xa1   : > { %602 = vmatprep.subr.mxu0 %v537_v44  ;;  %1945 = vmatpush2.msra.mxu1 %v538_v43  ;;  %v429_v43 = vmax.f32 %v2535_v34, 0.0 }
  0xa2   : > { %603 = vmatpush2.msra.mxu0 %v536_v45  ;;  %1914 = vmatprep.subr.mxu1 %v537_v44  ;;  %v2548_v44 = vld [vmem:[%s2466_s22 + $0x40] sm:$0xff] }
  0xa3   : > { %604 = vmatprep.subr.mxu0 %v535_v46  ;;  %1946 = vmatpush2.msra.mxu1 %v536_v45  ;;  %v1241_v45 = vld [vmem:[#allocation10 + $0xd8] sm:$0xff] }
  0xa4   : > { %605 = vmatpush2.msra.mxu0 %v534_v47  ;;  %1915 = vmatprep.subr.mxu1 %v535_v46  ;;  %v2551_v46 = vld [vmem:[%s2466_s22 + $0x58] sm:$0xff] }
  0xa5   : > { %606 = vmatprep.subr.mxu0 %v533_v48  ;;  %1947 = vmatpush2.msra.mxu1 %v534_v47  ;;  %v458_v47 = vmax.f32 %v2540_v38, 0.0 }
  0xa6   : > { %607 = vmatpush2.msra.mxu0 %v532_v49  ;;  %1916 = vmatprep.subr.mxu1 %v533_v48  ;;  %v906_v48 = vld [vmem:[#allocation8 + $0xc8] sm:$0xff] }
  0xa7   : > { %608 = vmatprep.subr.mxu0 %v531_v50  ;;  %1948 = vmatpush2.msra.mxu1 %v532_v49  ;;  %v461_v49 = vmax.f32 %v2544_v41, 0.0 }
  0xa8   : > { %609 = vmatpush2.msra.mxu0 %v530_v51  ;;  %1917 = vmatprep.subr.mxu1 %v531_v50  ;;  %v2556_v50 = vld [vmem:[%s2466_s22 + $0x140] sm:$0xff] }
  0xa9   : > { %610 = vmatprep.subr.mxu0 %v529_v52  ;;  %1949 = vmatpush2.msra.mxu1 %v530_v51  ;;  %v1240_v51 = vld [vmem:[#allocation10 + $0xd0] sm:$0xff] }
  0xaa   : > { %611 = vmatpush2.msra.mxu0 %v528_v53  ;;  %1918 = vmatprep.subr.mxu1 %v529_v52  ;;  %v428_v52 = vmax.f32 %v2548_v44, 0.0 }
  0xab   : > { %612 = vmatprep.subr.mxu0 %v527_v54  ;;  %1950 = vmatpush2.msra.mxu1 %v528_v53  ;;  %v2560_v53 = vld [vmem:[%s2466_s22 + $0x158] sm:$0xff] }
  0xac   : > { %613 = vmatpush2.msra.mxu0 %v526_v55  ;;  %1919 = vmatprep.subr.mxu1 %v527_v54  ;;  %v905_v54 = vld [vmem:[#allocation8 + $0xc0] sm:$0xff] }
  0xad   : > { %614 = vmatprep.subr.mxu0 %v525_v56  ;;  %1951 = vmatpush2.msra.mxu1 %v526_v55  ;;  %v431_v55 = vmax.f32 %v2551_v46, 0.0 }
  0xae   : > { %615 = vmatpush2.msra.mxu0 %v524_v57  ;;  %1920 = vmatprep.subr.mxu1 %v525_v56  ;;  %v2564_v56 = vld [vmem:[%s2466_s22 + $0x50] sm:$0xff] }
  0xaf   : > { %616 = vmatprep.subr.mxu0 %v523_v58  ;;  %1952 = vmatpush2.msra.mxu1 %v524_v57  ;;  %v1239_v57 = vld [vmem:[#allocation10 + $0xc8] sm:$0xff] }
  0xb0   : > { %617 = vmatpush2.msra.mxu0 %v522_v59  ;;  %1921 = vmatprep.subr.mxu1 %v523_v58  ;;  %v2567_v58 = vld [vmem:[%s2466_s22 + $0x68] sm:$0xff] }
  0xb1   : > { %618 = vmatprep.subr.mxu0 %v521_v60  ;;  %1953 = vmatpush2.msra.mxu1 %v522_v59  ;;  %v460_v59 = vmax.f32 %v2556_v50, 0.0 }
  0xb2   : > { %619 = vmatpush2.msra.mxu0 %v520_v61  ;;  %1922 = vmatprep.subr.mxu1 %v521_v60  ;;  %v904_v60 = vld [vmem:[#allocation8 + $0xb8] sm:$0xff] }
  0xb3   : > { %620 = vmatprep.subr.mxu0 %v519_v62  ;;  %1954 = vmatpush2.msra.mxu1 %v520_v61  ;;  %v463_v61 = vmax.f32 %v2560_v53, 0.0 }
  0xb4   : > { %621 = vmatpush2.msra.mxu0 %v518_v0  ;;  %1923 = vmatprep.subr.mxu1 %v519_v62  ;;  %v2572_v62 = vld [vmem:[%s2466_s22 + $0x150] sm:$0xff] }
  0xb5   : > { %622 = vmatprep.subr.mxu0 %v517_v3  ;;  %1955 = vmatpush2.msra.mxu1 %v518_v0  ;;  %v1238_v0 = vld [vmem:[#allocation10 + $0xc0] sm:$0xff] }
  0xb6   : > { %623 = vmatpush2.msra.mxu0 %v516_v5  ;;  %1924 = vmatprep.subr.mxu1 %v517_v3  ;;  %v430_v3 = vmax.f32 %v2564_v56, 0.0 }
  0xb7   : > { %625 = vmatmul.mubr.f32.vlgmr.msra.gmra.mxu0 %v420_v6  ;;  %1956 = vmatpush2.msra.mxu1 %v516_v5  ;;  %v2576_v5 = vld [vmem:[%s2466_s22 + $0x168] sm:$0xff]  ;;  %v903_v6 = vld [vmem:[#allocation8 + $0xb0] sm:$0xff] }
  0xb8   : > { %630 = vmatprep.mubr.f32.mxu0 %v423_v8  ;;  %720 = vmatprep.mubr.f32.mxu1 %v453_v10  ;;  %v433_v8 = vmax.f32 %v2567_v58, 0.0  ;;  %v2580_v10 = vld [vmem:[%s2466_s22 + $0x60] sm:$0xff] }
  0xb9   : > { %721 = vmatmul.mubr.f32.vlgmr.msra.gmra.mxu1 %v452_v12  ;;  %957 = vmatprep.subr.mxu1 %v912_v15  ;;  %v1237_v12 = vld [vmem:[#allocation10 + $0xb8] sm:$0xff]  ;;  %v462_v15 = vmax.f32 %v2572_v62, 0.0 }
  0xba   : > { %726 = vmatprep.mubr.f32.mxu1 %v455_v13  ;;  %958 = vmatpush1.msra.mxu1 %v911_v18  ;;  %v2583_v13 = vld [vmem:[%s2466_s22 + $0x78] sm:$0xff]  ;;  %v465_v18 = vmax.f32 %v2576_v5, 0.0 }
  0xbb   : > { %631 = vmatmul.mubr.f32.gmra.mxu0 %v422_v16  ;;  %1278 = vmatprep.subr.mxu0 %v1245_v21  ;;  %v902_v16 = vld [vmem:[#allocation8 + $0xa8] sm:$0xff]  ;;  %v1236_v21 = vld [vmem:[#allocation10 + $0xb0] sm:$0xff] }
  0xbc   : > { %636 = vmatprep.mubr.f32.mxu0 %v425_v19  ;;  %959 = vmatprep.subr.mxu1 %v910_v24  ;;  %v2588_v19 = vld [vmem:[%s2466_s22 + $0x160] sm:$0xff]  ;;  %v2592_v24 = vld [vmem:[%s2466_s22 + $0x178] sm:$0xff] }
  0xbd   : > { %727 = vmatmul.mubr.f32.gmra.mxu1 %v454_v23  ;;  %1279 = vmatpush1.msra.mxu0 %v1244_v27  ;;  %v432_v23 = vmax.f32 %v2580_v10, 0.0  ;;  %v435_v27 = vmax.f32 %v2583_v13, 0.0 }
  0xbe   : > { %732 = vmatprep.mubr.f32.mxu1 %v457_v25  ;;  %960 = vmatpush1.msra.mxu1 %v909_v30  ;;  %v901_v25 = vld [vmem:[#allocation8 + $0xa0] sm:$0xff]  ;;  %v1235_v30 = vld [vmem:[#allocation10 + $0xa8] sm:$0xff] }
  0xbf   : > { %637 = vmatmul.mubr.f32.gmra.mxu0 %v424_v28  ;;  %1280 = vmatprep.subr.mxu0 %v1243_v33  ;;  %v2596_v28 = vld [vmem:[%s2466_s22 + $0x70] sm:$0xff]  ;;  %v464_v33 = vmax.f32 %v2588_v19, 0.0 }
  0xc0   : > { %642 = vmatprep.mubr.f32.mxu0 %v427_v31  ;;  %961 = vmatprep.subr.mxu1 %v908_v36  ;;  %v2599_v31 = vld [vmem:[%s2466_s22 + $0x88] sm:$0xff]  ;;  %v467_v36 = vmax.f32 %v2592_v24, 0.0 }
  0xc1   : > { %733 = vmatmul.mubr.f32.gmra.mxu1 %v456_v35  ;;  %1281 = vmatpush1.msra.mxu0 %v1242_v39  ;;  %v900_v35 = vld [vmem:[#allocation8 + $0x98] sm:$0xff]  ;;  %v1234_v39 = vld [vmem:[#allocation10 + $0xa0] sm:$0xff] }
  0xc2   : > { %738 = vmatprep.mubr.f32.mxu1 %v459_v37  ;;  %962 = vmatpush1.msra.mxu1 %v907_v42  ;;  %v2604_v37 = vld [vmem:[%s2466_s22 + $0x170] sm:$0xff]  ;;  %v2608_v42 = vld [vmem:[%s2466_s22 + $0x188] sm:$0xff] }
  0xc3   : > { %643 = vmatmul.mubr.f32.gmra.mxu0 %v426_v40  ;;  %1282 = vmatprep.subr.mxu0 %v1241_v45  ;;  %v434_v40 = vmax.f32 %v2596_v28, 0.0  ;;  %3394 = vst [vmem:[#allocation16_spill] sm:$0xff] %v2608_v42  ;;  %v437_v45 = vmax.f32 %v2599_v31, 0.0 }
  0xc4   : > { %648 = vmatprep.mubr.f32.mxu0 %v429_v43  ;;  %963 = vmatprep.subr.mxu1 %v906_v48  ;;  %v899_v43 = vld [vmem:[#allocation8 + $0x90] sm:$0xff]  ;;  %v1233_v48 = vld [vmem:[#allocation10 + $0x98] sm:$0xff] }
  0xc5   : > { %739 = vmatmul.mubr.f32.gmra.mxu1 %v458_v47  ;;  %1283 = vmatpush1.msra.mxu0 %v1240_v51  ;;  %v2612_v47 = vld [vmem:[%s2466_s22 + $0x80] sm:$0xff]  ;;  %v466_v51 = vmax.f32 %v2604_v37, 0.0 }
  0xc6   : > { %744 = vmatprep.mubr.f32.mxu1 %v461_v49  ;;  %964 = vmatpush1.msra.mxu1 %v905_v54  ;;  %v2615_v49 = vld [vmem:[%s2466_s22 + $0x98] sm:$0xff]  ;;  %v469_v54 = vmax.f32 %v2608_v42, 0.0 }
  0xc7   : > { %649 = vmatmul.mubr.f32.gmra.mxu0 %v428_v52  ;;  %1284 = vmatprep.subr.mxu0 %v1239_v57  ;;  %v898_v52 = vld [vmem:[#allocation8 + $0x88] sm:$0xff]  ;;  %v1232_v57 = vld [vmem:[#allocation10 + $0x90] sm:$0xff] }
  0xc8   : > { %654 = vmatprep.mubr.f32.mxu0 %v431_v55  ;;  %965 = vmatprep.subr.mxu1 %v904_v60  ;;  %v2620_v55 = vld [vmem:[%s2466_s22 + $0x180] sm:$0xff]  ;;  %v2624_v60 = vld [vmem:[%s2466_s22 + $0x198] sm:$0xff] }
  0xc9   : > { %745 = vmatmul.mubr.f32.gmra.mxu1 %v460_v59  ;;  %1285 = vmatpush1.msra.mxu0 %v1238_v0  ;;  %3395 = vst [vmem:[#allocation17_spill] sm:$0xff] %v2620_v55  ;;  %v436_v59 = vmax.f32 %v2612_v47, 0.0  ;;  %3396 = vst [vmem:[#allocation18_spill] sm:$0xff] %v2624_v60  ;;  %v439_v0 = vmax.f32 %v2615_v49, 0.0  ;;  %v883_v42 = vld [vmem:[#allocation8 + $0x10] sm:$0xff] }
  0xca   : > { %750 = vmatprep.mubr.f32.mxu1 %v463_v61  ;;  %966 = vmatpush1.msra.mxu1 %v903_v6  ;;  %v897_v61 = vld [vmem:[#allocation8 + $0x80] sm:$0xff]  ;;  %v1231_v6 = vld [vmem:[#allocation10 + $0x88] sm:$0xff] }
  0xcb   : > { %655 = vmatmul.mubr.f32.gmra.mxu0 %v430_v3  ;;  %1286 = vmatprep.subr.mxu0 %v1237_v12  ;;  %v2628_v3 = vld [vmem:[%s2466_s22 + $0x90] sm:$0xff]  ;;  %v468_v12 = vmax.f32 %v2620_v55, 0.0 }
  0xcc   : > { %660 = vmatprep.mubr.f32.mxu0 %v433_v8  ;;  %967 = vmatprep.subr.mxu1 %v902_v16  ;;  %v2631_v8 = vld [vmem:[%s2466_s22 + $0xa8] sm:$0xff]  ;;  %v471_v16 = vmax.f32 %v2624_v60, 0.0  ;;  %v2720_v60 = vld [vmem:[%s2466_s22 + $0x1f8] sm:$0xff]  ;;  %v2729_v55 = vld [vmem:[%s2466_s22 + $0x1f0] sm:$0xff] }
  0xcd   : > { %751 = vmatmul.mubr.f32.gmra.mxu1 %v462_v15  ;;  %1287 = vmatpush1.msra.mxu0 %v1236_v21  ;;  %v896_v15 = vld [vmem:[#allocation8 + $0x78] sm:$0xff]  ;;  %v1230_v21 = vld [vmem:[#allocation10 + $0x80] sm:$0xff]  ;;  %3408 = vst [vmem:[#allocation30_spill] sm:$0xff] %v2720_v60 }
  0xce   : > { %756 = vmatprep.mubr.f32.mxu1 %v465_v18  ;;  %968 = vmatpush1.msra.mxu1 %v901_v25  ;;  %v2636_v18 = vld [vmem:[%s2466_s22 + $0x190] sm:$0xff]  ;;  %v2640_v25 = vld [vmem:[%s2466_s22 + $0x1a8] sm:$0xff] }
  0xcf   : > { %661 = vmatmul.mubr.f32.gmra.mxu0 %v432_v23  ;;  %1288 = vmatprep.subr.mxu0 %v1235_v30  ;;  %3397 = vst [vmem:[#allocation19_spill] sm:$0xff] %v2636_v18  ;;  %v438_v23 = vmax.f32 %v2628_v3, 0.0  ;;  %3398 = vst [vmem:[#allocation20_spill] sm:$0xff] %v2640_v25  ;;  %v441_v30 = vmax.f32 %v2631_v8, 0.0 }
  0xd0   : > { %666 = vmatprep.mubr.f32.mxu0 %v435_v27  ;;  %969 = vmatprep.subr.mxu1 %v900_v35  ;;  %v895_v27 = vld [vmem:[#allocation8 + $0x70] sm:$0xff]  ;;  %v1229_v35 = vld [vmem:[#allocation10 + $0x78] sm:$0xff] }
  0xd1   : > { %757 = vmatmul.mubr.f32.gmra.mxu1 %v464_v33  ;;  %1289 = vmatpush1.msra.mxu0 %v1234_v39  ;;  %v2644_v33 = vld [vmem:[%s2466_s22 + $0xa0] sm:$0xff]  ;;  %v470_v39 = vmax.f32 %v2636_v18, 0.0 }
  0xd2   : > { %762 = vmatprep.mubr.f32.mxu1 %v467_v36  ;;  %970 = vmatpush1.msra.mxu1 %v899_v43  ;;  %v2647_v36 = vld [vmem:[%s2466_s22 + $0xb8] sm:$0xff]  ;;  %v473_v43 = vmax.f32 %v2640_v25, 0.0  ;;  %v2704_v25 = vld [vmem:[%s2466_s22 + $0x1e8] sm:$0xff]  ;;  %v2716_v18 = vld [vmem:[%s2466_s22 + $0x1e0] sm:$0xff] }
  0xd3   : > { %667 = vmatmul.mubr.f32.gmra.mxu0 %v434_v40  ;;  %1290 = vmatprep.subr.mxu0 %v1233_v48  ;;  %v894_v40 = vld [vmem:[#allocation8 + $0x68] sm:$0xff]  ;;  %v1228_v48 = vld [vmem:[#allocation10 + $0x70] sm:$0xff]  ;;  %3406 = vst [vmem:[#allocation28_spill] sm:$0xff] %v2704_v25  ;;  %3407 = vst [vmem:[#allocation29_spill] sm:$0xff] %v2716_v18 }
  0xd4   : > { %672 = vmatprep.mubr.f32.mxu0 %v437_v45  ;;  %971 = vmatprep.subr.mxu1 %v898_v52  ;;  %v2652_v45 = vld [vmem:[%s2466_s22 + $0x1a0] sm:$0xff]  ;;  %v2656_v52 = vld [vmem:[%s2466_s22 + $0x1b8] sm:$0xff] }
  0xd5   : > { %763 = vmatmul.mubr.f32.gmra.mxu1 %v466_v51  ;;  %1291 = vmatpush1.msra.mxu0 %v1232_v57  ;;  %3399 = vst [vmem:[#allocation21_spill] sm:$0xff] %v2652_v45  ;;  %v440_v51 = vmax.f32 %v2644_v33, 0.0  ;;  %3400 = vst [vmem:[#allocation22_spill] sm:$0xff] %v2656_v52  ;;  %v443_v57 = vmax.f32 %v2647_v36, 0.0 }
  0xd6   : > { %768 = vmatprep.mubr.f32.mxu1 %v469_v54  ;;  %972 = vmatpush1.msra.mxu1 %v897_v61  ;;  %v893_v54 = vld [vmem:[#allocation8 + $0x60] sm:$0xff]  ;;  %v1227_v61 = vld [vmem:[#allocation10 + $0x68] sm:$0xff] }
  0xd7   : > { %673 = vmatmul.mubr.f32.gmra.mxu0 %v436_v59  ;;  %1292 = vmatprep.subr.mxu0 %v1231_v6  ;;  %v2660_v59 = vld [vmem:[%s2466_s22 + $0xb0] sm:$0xff]  ;;  %v472_v6 = vmax.f32 %v2652_v45, 0.0  ;;  %v1222_v45 = vld [vmem:[#allocation10 + $0x40] sm:$0xff] }
  0xd8   : > { %678 = vmatprep.mubr.f32.mxu0 %v439_v0  ;;  %973 = vmatprep.subr.mxu1 %v896_v15  ;;  %v2663_v0 = vld [vmem:[%s2466_s22 + $0xc8] sm:$0xff]  ;;  %v475_v15 = vmax.f32 %v2656_v52, 0.0  ;;  %v2688_v52 = vld [vmem:[%s2466_s22 + $0x1d8] sm:$0xff] }
  0xd9   : > { %769 = vmatmul.mubr.f32.gmra.mxu1 %v468_v12  ;;  %1293 = vmatpush1.msra.mxu0 %v1230_v21  ;;  %v892_v12 = vld [vmem:[#allocation8 + $0x58] sm:$0xff]  ;;  %v1226_v21 = vld [vmem:[#allocation10 + $0x60] sm:$0xff]  ;;  %3404 = vst [vmem:[#allocation26_spill] sm:$0xff] %v2688_v52 }
  0xda   : > { %774 = vmatprep.mubr.f32.mxu1 %v471_v16  ;;  %974 = vmatpush1.msra.mxu1 %v895_v27  ;;  %v2668_v16 = vld [vmem:[%s2466_s22 + $0x1b0] sm:$0xff]  ;;  %v2672_v27 = vld [vmem:[%s2466_s22 + $0x1c8] sm:$0xff] }
  0xdb   : > { %679 = vmatmul.mubr.f32.gmra.mxu0 %v438_v23  ;;  %1294 = vmatprep.subr.mxu0 %v1229_v35  ;;  %3401 = vst [vmem:[#allocation23_spill] sm:$0xff] %v2668_v16  ;;  %v442_v23 = vmax.f32 %v2660_v59, 0.0  ;;  %3402 = vst [vmem:[#allocation24_spill] sm:$0xff] %v2672_v27  ;;  %v445_v35 = vmax.f32 %v2663_v0, 0.0 }
  0xdc   : > { %684 = vmatprep.mubr.f32.mxu0 %v441_v30  ;;  %975 = vmatprep.subr.mxu1 %v894_v40  ;;  %v891_v30 = vld [vmem:[#allocation8 + $0x50] sm:$0xff]  ;;  %v1225_v40 = vld [vmem:[#allocation10 + $0x58] sm:$0xff] }
  0xdd   : > { %775 = vmatmul.mubr.f32.gmra.mxu1 %v470_v39  ;;  %1295 = vmatpush1.msra.mxu0 %v1228_v48  ;;  %v2676_v39 = vld [vmem:[%s2466_s22 + $0xc0] sm:$0xff]  ;;  %v474_v48 = vmax.f32 %v2668_v16, 0.0  ;;  %v2692_v16 = vld [vmem:[%s2466_s22 + $0xd0] sm:$0xff] }
  0xde   : > { %780 = vmatprep.mubr.f32.mxu1 %v473_v43  ;;  %976 = vmatpush1.msra.mxu1 %v893_v54  ;;  %v2679_v43 = vld [vmem:[%s2466_s22 + $0xd8] sm:$0xff]  ;;  %v477_v54 = vmax.f32 %v2672_v27, 0.0  ;;  %v2695_v27 = vld [vmem:[%s2466_s22 + $0xe8] sm:$0xff] }
  0xdf   : > { %685 = vmatmul.mubr.f32.gmra.mxu0 %v440_v51  ;;  %1296 = vmatprep.subr.mxu0 %v1227_v61  ;;  %v890_v51 = vld [vmem:[#allocation8 + $0x48] sm:$0xff]  ;;  %v1224_v61 = vld [vmem:[#allocation10 + $0x50] sm:$0xff] }
  0xe0   : > { %690 = vmatprep.mubr.f32.mxu0 %v443_v57  ;;  %977 = vmatprep.subr.mxu1 %v892_v12  ;;  %v2684_v57 = vld [vmem:[%s2466_s22 + $0x1c0] sm:$0xff]  ;;  %v444_v12 = vmax.f32 %v2676_v39, 0.0 }
  0xe1   : > { %781 = vmatmul.mubr.f32.gmra.mxu1 %v472_v6  ;;  %1297 = vmatpush1.msra.mxu0 %v1226_v21  ;;  %3403 = vst [vmem:[#allocation25_spill] sm:$0xff] %v2684_v57  ;;  %v889_v6 = vld [vmem:[#allocation8 + $0x40] sm:$0xff]  ;;  %v447_v21 = vmax.f32 %v2679_v43, 0.0 }
  0xe2   : > { %786 = vmatprep.mubr.f32.mxu1 %v475_v15  ;;  %978 = vmatpush1.msra.mxu1 %v891_v30  ;;  %v1223_v15 = vld [vmem:[#allocation10 + $0x48] sm:$0xff]  ;;  %v888_v30 = vld [vmem:[#allocation8 + $0x38] sm:$0xff] }
  0xe3   : > { %691 = vmatmul.mubr.f32.gmra.mxu0 %v442_v23  ;;  %1298 = vmatprep.subr.mxu0 %v1225_v40  ;;  %v476_v23 = vmax.f32 %v2684_v57, 0.0  ;;  %v479_v40 = vmax.f32 %v2688_v52, 0.0  ;;  %v2708_v57 = vld [vmem:[%s2466_s22 + $0xe0] sm:$0xff]  ;;  %v2711_v52 = vld [vmem:[%s2466_s22 + $0xf8] sm:$0xff] }
  0xe4   : > { %696 = vmatprep.mubr.f32.mxu0 %v445_v35  ;;  %979 = vmatprep.subr.mxu1 %v890_v51  ;;  %v2700_v35 = vld [vmem:[%s2466_s22 + $0x1d0] sm:$0xff]  ;;  %v446_v51 = vmax.f32 %v2692_v16, 0.0 }
  0xe5   : > { %787 = vmatmul.mubr.f32.gmra.mxu1 %v474_v48  ;;  %1299 = vmatpush1.msra.mxu0 %v1224_v61  ;;  %3405 = vst [vmem:[#allocation27_spill] sm:$0xff] %v2700_v35  ;;  %v887_v48 = vld [vmem:[#allocation8 + $0x30] sm:$0xff]  ;;  %v449_v61 = vmax.f32 %v2695_v27, 0.0 }
  0xe6   : > { %792 = vmatprep.mubr.f32.mxu1 %v477_v54  ;;  %980 = vmatpush1.msra.mxu1 %v889_v6  ;;  %v1221_v54 = vld [vmem:[#allocation10 + $0x38] sm:$0xff]  ;;  %v886_v6 = vld [vmem:[#allocation8 + $0x28] sm:$0xff] }
  0xe7   : > { %697 = vmatmul.mubr.f32.gmra.mxu0 %v444_v12  ;;  %1300 = vmatprep.subr.mxu0 %v1223_v15  ;;  %v478_v12 = vmax.f32 %v2700_v35, 0.0  ;;  %v481_v15 = vmax.f32 %v2704_v25, 0.0  ;;  %v451_v35 = vmax.f32 %v2711_v52, 0.0  ;;  %v480_v25 = vmax.f32 %v2716_v18, 0.0  ;;  %v1277_v18 = vld [vmem:[#allocation10 + $0x1f8] sm:$0xff] }
  0xe8   : > { %702 = vmatprep.mubr.f32.mxu0 %v447_v21  ;;  %981 = vmatprep.subr.mxu1 %v888_v30  ;;  %v1220_v21 = vld [vmem:[#allocation10 + $0x30] sm:$0xff]  ;;  %v448_v30 = vmax.f32 %v2708_v57, 0.0 }
  0xe9   : > { %793 = vmatmul.mubr.f32.gmra.mxu1 %v476_v23  ;;  %1301 = vmatpush1.msra.mxu0 %v1222_v45  ;;  %v885_v23 = vld [vmem:[#allocation8 + $0x20] sm:$0xff]  ;;  %v2724_v45 = vld [vmem:[%s2466_s22 + $0xf0] sm:$0xff] }
  0xea   : > { %798 = vmatprep.mubr.f32.mxu1 %v479_v40  ;;  %982 = vmatpush1.msra.mxu1 %v887_v48  ;;  %v1219_v40 = vld [vmem:[#allocation10 + $0x28] sm:$0xff]  ;;  %v884_v48 = vld [vmem:[#allocation8 + $0x18] sm:$0xff] }
  0xeb   : > { %703 = vmatmul.mubr.f32.gmra.mxu0 %v446_v51  ;;  %1302 = vmatprep.subr.mxu0 %v1221_v54  ;;  %v483_v51 = vmax.f32 %v2720_v60, 0.0  ;;  %v1218_v54 = vld [vmem:[#allocation10 + $0x20] sm:$0xff]  ;;  %v1215_v60 = vld [vmem:[#allocation10 + $0x8] sm:$0xff] }
  0xec   : > { %708 = vmatprep.mubr.f32.mxu0 %v449_v61  ;;  %983 = vmatprep.subr.mxu1 %v886_v6  ;;  %v450_v61 = vmax.f32 %v2724_v45, 0.0  ;;  %v1217_v6 = vld [vmem:[#allocation10 + $0x18] sm:$0xff] }
  0xed   : > { %799 = vmatmul.mubr.f32.gmra.mxu1 %v478_v12  ;;  %1303 = vmatpush1.msra.mxu0 %v1220_v21  ;;  %v482_v12 = vmax.f32 %v2729_v55, 0.0  ;;  %v882_v21 = vld [vmem:[#allocation8 + $0x8] sm:$0xff] }
  0xee   : > { %804 = vmatprep.mubr.f32.mxu1 %v481_v15  ;;  %984 = vmatpush1.msra.mxu1 %v885_v23  ;;  %v1216_v15 = vld [vmem:[#allocation10 + $0x10] sm:$0xff]  ;;  %v881_v23 = vld [vmem:[#allocation8] sm:$0xff] }
  0xef   : > { %709 = vmatmul.mubr.f32.gmra.mxu0 %v448_v30  ;;  %1304 = vmatprep.subr.mxu0 %v1219_v40  ;;  %v1214_v30 = vld [vmem:[#allocation10] sm:$0xff]  ;;  %v944_v40 = vld [vmem:[#allocation8 + $0x1f8] sm:$0xff] }
  0xf0   : > { %714 = vmatprep.mubr.f32.mxu0 %v451_v35  ;;  %985 = vmatprep.subr.mxu1 %v884_v48  ;;  %v943_v35 = vld [vmem:[#allocation8 + $0x1f0] sm:$0xff]  ;;  %v942_v48 = vld [vmem:[#allocation8 + $0x1e8] sm:$0xff] }
  0xf1   : > { %805 = vmatmul.mubr.f32.gmra.mxu1 %v480_v25  ;;  %1305 = vmatpush1.msra.mxu0 %v1218_v54  ;;  %v1276_v25 = vld [vmem:[#allocation10 + $0x1f0] sm:$0xff]  ;;  %v1275_v54 = vld [vmem:[#allocation10 + $0x1e8] sm:$0xff] }
  0xf2   : > { %810 = vmatprep.mubr.f32.mxu1 %v483_v51  ;;  %986 = vmatpush1.msra.mxu1 %v883_v42  ;;  %v941_v42 = vld [vmem:[#allocation8 + $0x1e0] sm:$0xff] }
  0xf3   : > { %715 = vmatmul.mubr.f32.gmra.mxu0 %v450_v61  ;;  %1306 = vmatprep.subr.mxu0 %v1217_v6  ;;  %v1274_v51 = vld [vmem:[#allocation10 + $0x1e0] sm:$0xff]  ;;  %v940_v61 = vld [vmem:[#allocation8 + $0x1d8] sm:$0xff] }
  0xf4   : > { %987 = vmatprep.subr.mxu1 %v882_v21  ;;  %1307 = vmatpush1.msra.mxu0 %v1216_v15  ;;  %v1273_v6 = vld [vmem:[#allocation10 + $0x1d8] sm:$0xff]  ;;  %v939_v21 = vld [vmem:[#allocation8 + $0x1d0] sm:$0xff] }
  0xf5   : > { %811 = vmatmul.mubr.f32.gmra.mxu1 %v482_v12  ;;  %1308 = vmatprep.subr.mxu0 %v1215_v60  ;;  %v1272_v15 = vld [vmem:[#allocation10 + $0x1d0] sm:$0xff]  ;;  %v938_v60 = vld [vmem:[#allocation8 + $0x1c8] sm:$0xff] }
  0xf6   : > { %988 = vmatpush1.msra.mxu1 %v881_v23  ;;  %1309 = vmatpush1.msra.mxu0 %v1214_v30  ;;  %v1271_v12 = vld [vmem:[#allocation10 + $0x1c8] sm:$0xff]  ;;  %v937_v23 = vld [vmem:[#allocation8 + $0x1c0] sm:$0xff] }
  0xf7   : > { %989 = vmatprep.subr.mxu1 %v944_v40  ;;  %1310 = vmatprep.subr.mxu0 %v1277_v18  ;;  %v1270_v30 = vld [vmem:[#allocation10 + $0x1c0] sm:$0xff]  ;;  %v936_v18 = vld [vmem:[#allocation8 + $0x1b8] sm:$0xff] }
  0xf8   : > { %990 = vmatpush2.msra.mxu1 %v943_v35  ;;  %1311 = vmatpush2.msra.mxu0 %v1276_v25  ;;  %v1269_v40 = vld [vmem:[#allocation10 + $0x1b8] sm:$0xff]  ;;  %v935_v35 = vld [vmem:[#allocation8 + $0x1b0] sm:$0xff] }
  0xf9   : > { %991 = vmatprep.subr.mxu1 %v942_v48  ;;  %1312 = vmatprep.subr.mxu0 %v1275_v54  ;;  %v1268_v25 = vld [vmem:[#allocation10 + $0x1b0] sm:$0xff]  ;;  %v934_v48 = vld [vmem:[#allocation8 + $0x1a8] sm:$0xff] }
  0xfa   : > { %992 = vmatpush2.msra.mxu1 %v941_v42  ;;  %1313 = vmatpush2.msra.mxu0 %v1274_v51  ;;  %v1267_v54 = vld [vmem:[#allocation10 + $0x1a8] sm:$0xff]  ;;  %v933_v42 = vld [vmem:[#allocation8 + $0x1a0] sm:$0xff] }
  0xfb   : > { %993 = vmatprep.subr.mxu1 %v940_v61  ;;  %1314 = vmatprep.subr.mxu0 %v1273_v6  ;;  %v1266_v51 = vld [vmem:[#allocation10 + $0x1a0] sm:$0xff]  ;;  %v932_v61 = vld [vmem:[#allocation8 + $0x198] sm:$0xff] }
  0xfc   : > { %994 = vmatpush2.msra.mxu1 %v939_v21  ;;  %1315 = vmatpush2.msra.mxu0 %v1272_v15  ;;  %v1265_v6 = vld [vmem:[#allocation10 + $0x198] sm:$0xff]  ;;  %v931_v21 = vld [vmem:[#allocation8 + $0x190] sm:$0xff] }
  0xfd   : > { %995 = vmatprep.subr.mxu1 %v938_v60  ;;  %1316 = vmatprep.subr.mxu0 %v1271_v12  ;;  %v1264_v15 = vld [vmem:[#allocation10 + $0x190] sm:$0xff]  ;;  %v930_v60 = vld [vmem:[#allocation8 + $0x188] sm:$0xff] }
  0xfe   : > { %996 = vmatpush2.msra.mxu1 %v937_v23  ;;  %1317 = vmatpush2.msra.mxu0 %v1270_v30  ;;  %v1263_v12 = vld [vmem:[#allocation10 + $0x188] sm:$0xff]  ;;  %v929_v23 = vld [vmem:[#allocation8 + $0x180] sm:$0xff] }
  0xff   : > { %997 = vmatprep.subr.mxu1 %v936_v18  ;;  %1318 = vmatprep.subr.mxu0 %v1269_v40  ;;  %v1262_v30 = vld [vmem:[#allocation10 + $0x180] sm:$0xff]  ;;  %v928_v18 = vld [vmem:[#allocation8 + $0x178] sm:$0xff] }
 0x100   : > { %998 = vmatpush2.msra.mxu1 %v935_v35  ;;  %1319 = vmatpush2.msra.mxu0 %v1268_v25  ;;  %v1261_v40 = vld [vmem:[#allocation10 + $0x178] sm:$0xff]  ;;  %v927_v35 = vld [vmem:[#allocation8 + $0x170] sm:$0xff] }
 0x101   : > { %999 = vmatprep.subr.mxu1 %v934_v48  ;;  %1320 = vmatprep.subr.mxu0 %v1267_v54  ;;  %v1260_v25 = vld [vmem:[#allocation10 + $0x170] sm:$0xff]  ;;  %v926_v48 = vld [vmem:[#allocation8 + $0x168] sm:$0xff] }
 0x102   : > { %1000 = vmatpush2.msra.mxu1 %v933_v42  ;;  %1321 = vmatpush2.msra.mxu0 %v1266_v51  ;;  %v1259_v54 = vld [vmem:[#allocation10 + $0x168] sm:$0xff]  ;;  %v925_v42 = vld [vmem:[#allocation8 + $0x160] sm:$0xff] }
 0x103   : > { %1001 = vmatprep.subr.mxu1 %v932_v61  ;;  %1322 = vmatprep.subr.mxu0 %v1265_v6  ;;  %v1258_v51 = vld [vmem:[#allocation10 + $0x160] sm:$0xff]  ;;  %v924_v61 = vld [vmem:[#allocation8 + $0x158] sm:$0xff] }
 0x104   : > { %1002 = vmatpush2.msra.mxu1 %v931_v21  ;;  %1323 = vmatpush2.msra.mxu0 %v1264_v15  ;;  %v1257_v6 = vld [vmem:[#allocation10 + $0x158] sm:$0xff]  ;;  %v923_v21 = vld [vmem:[#allocation8 + $0x150] sm:$0xff] }
 0x105   : > { %1003 = vmatprep.subr.mxu1 %v930_v60  ;;  %1324 = vmatprep.subr.mxu0 %v1263_v12  ;;  %v1256_v15 = vld [vmem:[#allocation10 + $0x150] sm:$0xff]  ;;  %v922_v60 = vld [vmem:[#allocation8 + $0x148] sm:$0xff] }
 0x106   : > { %1004 = vmatpush2.msra.mxu1 %v929_v23  ;;  %1325 = vmatpush2.msra.mxu0 %v1262_v30  ;;  %v1255_v12 = vld [vmem:[#allocation10 + $0x148] sm:$0xff]  ;;  %v921_v23 = vld [vmem:[#allocation8 + $0x140] sm:$0xff] }
 0x107   : > { %1005 = vmatprep.subr.mxu1 %v928_v18  ;;  %1326 = vmatprep.subr.mxu0 %v1261_v40  ;;  %v1254_v30 = vld [vmem:[#allocation10 + $0x140] sm:$0xff]  ;;  %v920_v18 = vld [vmem:[#allocation8 + $0x138] sm:$0xff] }
 0x108   : > { %1006 = vmatpush2.msra.mxu1 %v927_v35  ;;  %1327 = vmatpush2.msra.mxu0 %v1260_v25  ;;  %v1253_v40 = vld [vmem:[#allocation10 + $0x138] sm:$0xff]  ;;  %v919_v35 = vld [vmem:[#allocation8 + $0x130] sm:$0xff] }
 0x109   : > { %1007 = vmatprep.subr.mxu1 %v926_v48  ;;  %1328 = vmatprep.subr.mxu0 %v1259_v54  ;;  %v1252_v25 = vld [vmem:[#allocation10 + $0x130] sm:$0xff]  ;;  %v918_v48 = vld [vmem:[#allocation8 + $0x128] sm:$0xff] }
 0x10a   : > { %1008 = vmatpush2.msra.mxu1 %v925_v42  ;;  %1329 = vmatpush2.msra.mxu0 %v1258_v51  ;;  %v1251_v54 = vld [vmem:[#allocation10 + $0x128] sm:$0xff]  ;;  %v917_v42 = vld [vmem:[#allocation8 + $0x120] sm:$0xff] }
 0x10b   : > { %1009 = vmatprep.subr.mxu1 %v924_v61  ;;  %1330 = vmatprep.subr.mxu0 %v1257_v6  ;;  %v1250_v51 = vld [vmem:[#allocation10 + $0x120] sm:$0xff]  ;;  %v916_v61 = vld [vmem:[#allocation8 + $0x118] sm:$0xff] }
 0x10c   : > { %1010 = vmatpush2.msra.mxu1 %v923_v21  ;;  %1331 = vmatpush2.msra.mxu0 %v1256_v15  ;;  %v1249_v6 = vld [vmem:[#allocation10 + $0x118] sm:$0xff]  ;;  %v915_v21 = vld [vmem:[#allocation8 + $0x110] sm:$0xff] }
 0x10d   : > { %1011 = vmatprep.subr.mxu1 %v922_v60  ;;  %1332 = vmatprep.subr.mxu0 %v1255_v12  ;;  %v1248_v15 = vld [vmem:[#allocation10 + $0x110] sm:$0xff]  ;;  %v914_v60 = vld [vmem:[#allocation8 + $0x108] sm:$0xff] }
 0x10e   : > { %1012 = vmatpush2.msra.mxu1 %v921_v23  ;;  %1333 = vmatpush2.msra.mxu0 %v1254_v30  ;;  %v1247_v12 = vld [vmem:[#allocation10 + $0x108] sm:$0xff]  ;;  %v913_v23 = vld [vmem:[#allocation8 + $0x100] sm:$0xff] }
 0x10f   : > { %1013 = vmatprep.subr.mxu1 %v920_v18  ;;  %1334 = vmatprep.subr.mxu0 %v1253_v40  ;;  %v1246_v30 = vld [vmem:[#allocation10 + $0x100] sm:$0xff] }
 0x110   : > { %1014 = vmatpush2.msra.mxu1 %v919_v35  ;;  %1335 = vmatpush2.msra.mxu0 %v1252_v25  ;;  %v2048_v18 = vld [vmem:[%s2466_s22 + $0x8] sm:$0xff]  ;;  %s2187_s22 = scalar_lea.vmem %s2186_s11, 16384 }
 0x111   : > { %1015 = vmatprep.subr.mxu1 %v918_v48  ;;  %1336 = vmatprep.subr.mxu0 %v1251_v54  ;;  %v3419_v54 = vld [vmem:[#allocation26_spill] sm:$0xff]  ;;  %p2189_p13 = scmp.lt.s32.totalorder %s2187_s22, %s2181_s14 }
 0x112   : > { %1016 = vmatpush2.msra.mxu1 %v917_v42  ;;  %1337 = vmatpush2.msra.mxu0 %v1250_v51 }
 0x113   : > { %1017 = vmatprep.subr.mxu1 %v916_v61  ;;  %1338 = vmatprep.subr.mxu0 %v1249_v6  ;;  %v3420_v6 = vld [vmem:[#allocation27_spill] sm:$0xff]  ;;  %p2190_p3 = por %p2189_p13, %p2188_p1 }
 0x114   : > { %1018 = vmatpush2.msra.mxu1 %v915_v21  ;;  %1339 = vmatpush2.msra.mxu0 %v1248_v15 }
 0x115   : > { %1019 = vmatprep.subr.mxu1 %v914_v60  ;;  %1340 = vmatprep.subr.mxu0 %v1247_v12  ;;  %p2191_p5 = pnand %p2190_p3, %p2184_p7 }
 0x116   : > { %1020 = vmatpush2.msra.mxu1 %v913_v23  ;;  %1341 = vmatpush2.msra.mxu0 %v1246_v30  ;;  %v3421_v23 = vld [vmem:[#allocation28_spill] sm:$0xff] }
 0x117   : > { %1342 = vmatprep.mubr.f32.mxu0 %v2048_v18 }
 0x118   : > { %1343 = vmatmul.mubr.f32.vlgmr.msra.gmra.mxu0 %v2482_v63  ;;  %v550_v63 = vlaneseq }
 0x119   : > { %1348 = vmatprep.mubr.f32.mxu0 %v2485_v1 }
 0x11a   : > { %v551_v1 = vshrl.u32 %v550_v63, 7 }
 0x11c   : > { %1349 = vmatmul.mubr.f32.gmra.mxu0 %v2499_v9 }
 0x11d   : > { %1354 = vmatprep.mubr.f32.mxu0 %v2503_v11  ;;  %v3409_v11 = vld [vmem:[#allocation16_spill] sm:$0xff] }
 0x120   : > { %1355 = vmatmul.mubr.f32.gmra.mxu0 %v2516_v20  ;;  %v3410_v20 = vld [vmem:[#allocation17_spill] sm:$0xff] }
 0x121   : > { %1360 = vmatprep.mubr.f32.mxu0 %v2519_v22 }
 0x124   : > { %1361 = vmatmul.mubr.f32.gmra.mxu0 %v2532_v32  ;;  %v3411_v32 = vld [vmem:[#allocation18_spill] sm:$0xff] }
 0x125   : > { %1366 = vmatprep.mubr.f32.mxu0 %v2535_v34 }
 0x128   : > { %1367 = vmatmul.mubr.f32.gmra.mxu0 %v2548_v44 }
 0x129   : > { %1372 = vmatprep.mubr.f32.mxu0 %v2551_v46  ;;  %v3412_v46 = vld [vmem:[#allocation19_spill] sm:$0xff] }
 0x12c   : > { %1373 = vmatmul.mubr.f32.gmra.mxu0 %v2564_v56 }
 0x12d   : > { %1378 = vmatprep.mubr.f32.mxu0 %v2567_v58 }
 0x130   : > { %1379 = vmatmul.mubr.f32.gmra.mxu0 %v2580_v10 }
 0x131   : > { %1384 = vmatprep.mubr.f32.mxu0 %v2583_v13 }
 0x134   : > { %1385 = vmatmul.mubr.f32.gmra.mxu0 %v2596_v28 }
 0x135   : > { %1390 = vmatprep.mubr.f32.mxu0 %v2599_v31 }
 0x138   : > { %1391 = vmatmul.mubr.f32.gmra.mxu0 %v2612_v47 }
 0x139   : > { %1396 = vmatprep.mubr.f32.mxu0 %v2615_v49  ;;  %v3415_v49 = vld [vmem:[#allocation22_spill] sm:$0xff] }
 0x13c   : > { %1397 = vmatmul.mubr.f32.gmra.mxu0 %v2628_v3 }
 0x13d   : > { %1402 = vmatprep.mubr.f32.mxu0 %v2631_v8 }
 0x140   : > { %1403 = vmatmul.mubr.f32.gmra.mxu0 %v2644_v33 }
 0x141   : > { %1408 = vmatprep.mubr.f32.mxu0 %v2647_v36  ;;  %v3416_v36 = vld [vmem:[#allocation23_spill] sm:$0xff] }
 0x144   : > { %1409 = vmatmul.mubr.f32.gmra.mxu0 %v2660_v59 }
 0x145   : > { %1414 = vmatprep.mubr.f32.mxu0 %v2663_v0 }
 0x148   : > { %1415 = vmatmul.mubr.f32.gmra.mxu0 %v2676_v39 }
 0x149   : > { %1420 = vmatprep.mubr.f32.mxu0 %v2679_v43 }
 0x14c   : > { %1421 = vmatmul.mubr.f32.gmra.mxu0 %v2692_v16 }
 0x14d   : > { %1426 = vmatprep.mubr.f32.mxu0 %v2695_v27  ;;  %v3417_v27 = vld [vmem:[#allocation24_spill] sm:$0xff] }
 0x150   : > { %1427 = vmatmul.mubr.f32.gmra.mxu0 %v2708_v57 }
 0x151   : > { %1432 = vmatprep.mubr.f32.mxu0 %v2711_v52 }
 0x154   : > { %1433 = vmatmul.mubr.f32.gmra.mxu0 %v2724_v45  ;;  %v3418_v45 = vld [vmem:[#allocation25_spill] sm:$0xff] }
 0x155   : > { %1438 = vmatprep.mubr.f32.mxu0 %v2488_v2  ;;  %v2779_v2 = vsub.s32 0, %v551_v1 }
 0x158   : > { %1439 = vmatmul.mubr.f32.gmra.mxu0 %v2491_v4  ;;  %v548_v4 = vld [vmem:[#allocation7] sm:$0x3] }
 0x159   : > { %1444 = vmatprep.mubr.f32.mxu0 %v2495_v7  ;;  %v2782_v7 = vsub.s32 1, %v551_v1  ;;  %v2786_v9 = vrot.slane %v548_v4, %v2779_v2  ;;  %v3422_v1 = vld [vmem:[#allocation29_spill] sm:$0xff] }
 0x15c   : > { %1445 = vmatmul.mubr.f32.gmra.mxu0 %v2508_v14  ;;  %v2790_v14 = vrot.slane %v548_v4, %v2782_v7 }
 0x15d   : > { %1450 = vmatprep.mubr.f32.mxu0 %v2512_v17 }
 0x160   : > { %1451 = vmatmul.mubr.f32.gmra.mxu0 %v2524_v26 }
 0x161   : > { %1456 = vmatprep.mubr.f32.mxu0 %v2528_v29 }
 0x164   : > { %1457 = vmatmul.mubr.f32.gmra.mxu0 %v2540_v38 }
 0x165   : > { %1462 = vmatprep.mubr.f32.mxu0 %v2544_v41 }
 0x168   : > { %1463 = vmatmul.mubr.f32.gmra.mxu0 %v2556_v50 }
 0x169   : > { %1468 = vmatprep.mubr.f32.mxu0 %v2560_v53 }
 0x16c   : > { %1469 = vmatmul.mubr.f32.gmra.mxu0 %v2572_v62  ;;  %v3413_v62 = vld [vmem:[#allocation20_spill] sm:$0xff] }
 0x16d   : > { %1474 = vmatprep.mubr.f32.mxu0 %v2576_v5 }
 0x170   : > { %1475 = vmatmul.mubr.f32.gmra.mxu0 %v2588_v19 }
 0x171   : > { %1480 = vmatprep.mubr.f32.mxu0 %v2592_v24  ;;  %v3414_v24 = vld [vmem:[#allocation21_spill] sm:$0xff] }
 0x174   : > { %1481 = vmatmul.mubr.f32.gmra.mxu0 %v2604_v37 }
 0x175   : > { %1486 = vmatprep.mubr.f32.mxu0 %v3409_v11 }
 0x177   : > { %v626_v17 = vpop.f32.mrf.mxu0 }
 0x178   : > { %1487 = vmatmul.mubr.f32.gmra.mxu0 %v3410_v20  ;;  %v627_v22 = vadd.f32 %v626_v17, %v2786_v9 }
 0x179   : > { %v628_v26 = vpop.f32.mrf.mxu0  ;;  %v2794_v29 = vpop.f32.mrf.mxu1  ;;  %1492 = vmatprep.mubr.f32.mxu0 %v3411_v32 }
 0x17a   : > { %v629_v34 = vadd.f32 %v628_v26, %v2790_v14  ;;  %v817_v50 = vmax.f32 %v627_v22, 0.0  ;;  %v3423_v22 = vld [vmem:[#allocation30_spill] sm:$0xff] }
 0x17b   : > { %v632_v38 = vpop.f32.mrf.mxu0  ;;  %v2798_v41 = vpop.f32.mrf.mxu1 }
 0x17c   : > { %v818_v44 = vmax.f32 %v629_v34, 0.0  ;;  %1493 = vmatmul.mubr.f32.gmra.mxu0 %v3412_v46  ;;  %v633_v53 = vadd.f32 %v632_v38, %v2786_v9 }
 0x17d   : > { %v634_v56 = vpop.f32.mrf.mxu0  ;;  %v2802_v58 = vpop.f32.mrf.mxu1  ;;  %1498 = vmatprep.mubr.f32.mxu0 %v3413_v62 }
 0x17e   : > { %v635_v5 = vadd.f32 %v634_v56, %v2790_v14  ;;  %1021 = vmatprep.mubr.f32.mxu1 %v818_v44  ;;  %v819_v28 = vmax.f32 %v633_v53, 0.0 }
 0x17f   : > { %v638_v10 = vpop.f32.mrf.mxu0  ;;  %1022 = vmatmul.mubr.f32.vlgmr.msra.gmra.mxu1 %v817_v50  ;;  %v2806_v13 = vpop.f32.mrf.mxu1 }
 0x180   : > { %v820_v19 = vmax.f32 %v635_v5, 0.0  ;;  %1499 = vmatmul.mubr.f32.gmra.mxu0 %v3414_v24  ;;  %v639_v31 = vadd.f32 %v638_v10, %v2786_v9 }
 0x181   : > { %v640_v37 = vpop.f32.mrf.mxu0  ;;  %v2810_v47 = vpop.f32.mrf.mxu1  ;;  %1504 = vmatprep.mubr.f32.mxu0 %v3415_v49 }
 0x182   : > { %v641_v3 = vadd.f32 %v640_v37, %v2790_v14  ;;  %1027 = vmatprep.mubr.f32.mxu1 %v820_v19  ;;  %v821_v52 = vmax.f32 %v639_v31, 0.0 }
 0x183   : > { %v644_v8 = vpop.f32.mrf.mxu0  ;;  %1028 = vmatmul.mubr.f32.gmra.mxu1 %v819_v28  ;;  %v2816_v16 = vpop.f32.mrf.mxu1 }
 0x184   : > { %v822_v33 = vmax.f32 %v641_v3, 0.0  ;;  %1505 = vmatmul.mubr.f32.gmra.mxu0 %v3416_v36  ;;  %v645_v59 = vadd.f32 %v644_v8, %v2786_v9 }
 0x185   : > { %v646_v0 = vpop.f32.mrf.mxu0  ;;  %1510 = vmatprep.mubr.f32.mxu0 %v3417_v27  ;;  %v2822_v48 = vpop.f32.mrf.mxu1 }
 0x186   : > { %v647_v39 = vadd.f32 %v646_v0, %v2790_v14  ;;  %1033 = vmatprep.mubr.f32.mxu1 %v822_v33  ;;  %v823_v40 = vmax.f32 %v645_v59, 0.0 }
 0x187   : > { %v650_v43 = vpop.f32.mrf.mxu0  ;;  %1034 = vmatmul.mubr.f32.gmra.mxu1 %v821_v52  ;;  %v2828_v12 = vpop.f32.mrf.mxu1 }
 0x188   : > { %v824_v57 = vmax.f32 %v647_v39, 0.0  ;;  %1511 = vmatmul.mubr.f32.gmra.mxu0 %v3418_v45  ;;  %v651_v35 = vadd.f32 %v650_v43, %v2786_v9 }
 0x189   : > { %v652_v25 = vpop.f32.mrf.mxu0  ;;  %1516 = vmatprep.mubr.f32.mxu0 %v3419_v54  ;;  %v2834_v20 = vpop.f32.mrf.mxu1 }
 0x18a   : > { %v653_v42 = vadd.f32 %v652_v25, %v2790_v14  ;;  %1039 = vmatprep.mubr.f32.mxu1 %v824_v57  ;;  %v825_v21 = vmax.f32 %v651_v35, 0.0 }
 0x18b   : > { %v656_v51 = vpop.f32.mrf.mxu0  ;;  %1040 = vmatmul.mubr.f32.gmra.mxu1 %v823_v40  ;;  %v2840_v50 = vpop.f32.mrf.mxu1 }
 0x18c   : > { %v826_v61 = vmax.f32 %v653_v42, 0.0  ;;  %1517 = vmatmul.mubr.f32.gmra.mxu0 %v3420_v6  ;;  %v657_v15 = vadd.f32 %v656_v51, %v2786_v9 }
 0x18d   : > { %v658_v60 = vpop.f32.mrf.mxu0  ;;  %1522 = vmatprep.mubr.f32.mxu0 %v3421_v23  ;;  %v2844_v24 = vpop.f32.mrf.mxu1 }
 0x18e   : > { %v659_v30 = vadd.f32 %v658_v60, %v2790_v14  ;;  %1045 = vmatprep.mubr.f32.mxu1 %v826_v61  ;;  %v827_v4 = vmax.f32 %v657_v15, 0.0 }
 0x18f   : > { %v662_v18 = vpop.f32.mrf.mxu0  ;;  %1046 = vmatmul.mubr.f32.gmra.mxu1 %v825_v21  ;;  %v2848_v8 = vpop.f32.mrf.mxu1 }
 0x190   : > { %v828_v63 = vmax.f32 %v659_v30, 0.0  ;;  %1523 = vmatmul.mubr.f32.gmra.mxu0 %v3422_v1  ;;  %v663_v11 = vadd.f32 %v662_v18, %v2786_v9 }
 0x191   : > { %v664_v17 = vpop.f32.mrf.mxu0  ;;  %1528 = vmatprep.mubr.f32.mxu0 %v3423_v22  ;;  %v2852_v39 = vpop.f32.mrf.mxu1 }
 0x192   : > { %v665_v26 = vadd.f32 %v664_v17, %v2790_v14  ;;  %1051 = vmatprep.mubr.f32.mxu1 %v828_v63  ;;  %v829_v38 = vmax.f32 %v663_v11, 0.0 }
 0x193   : > { %v668_v32 = vpop.f32.mrf.mxu0  ;;  %1052 = vmatmul.mubr.f32.gmra.mxu1 %v827_v4  ;;  %v2856_v54 = vpop.f32.mrf.mxu1 }
 0x194   : > { %v830_v34 = vmax.f32 %v665_v26, 0.0  ;;  %1529 = vmatmul.mubr.f32.gmra.mxu0 %v2729_v55  ;;  %v669_v44 = vadd.f32 %v668_v32, %v2786_v9 }
 0x195   : > { %v670_v46 = vpop.f32.mrf.mxu0  ;;  %v2860_v60 = vpop.f32.mrf.mxu1 }
 0x196   : > { %v671_v53 = vadd.f32 %v670_v46, %v2790_v14  ;;  %1057 = vmatprep.mubr.f32.mxu1 %v830_v34  ;;  %v831_v5 = vmax.f32 %v669_v44, 0.0 }
 0x197   : > { %v674_v56 = vpop.f32.mrf.mxu0  ;;  %1058 = vmatmul.mubr.f32.gmra.mxu1 %v829_v38  ;;  %v2864_v11 = vpop.f32.mrf.mxu1 }
 0x198   : > { %v832_v62 = vmax.f32 %v671_v53, 0.0  ;;  %v675_v10 = vadd.f32 %v674_v56, %v2786_v9 }
 0x199   : > { %v676_v19 = vpop.f32.mrf.mxu0  ;;  %v2868_v44 = vpop.f32.mrf.mxu1 }
 0x19a   : > { %v677_v55 = vadd.f32 %v676_v19, %v2790_v14  ;;  %1063 = vmatprep.mubr.f32.mxu1 %v832_v62  ;;  %v833_v37 = vmax.f32 %v675_v10, 0.0  ;;  %v725_v62 = vadd.f32 %v2798_v41, %v2790_v14 }
 0x19b   : > { %v680_v28 = vpop.f32.mrf.mxu0  ;;  %1064 = vmatmul.mubr.f32.gmra.mxu1 %v831_v5 }
 0x19c   : > { %v834_v31 = vmax.f32 %v677_v55, 0.0  ;;  %v681_v49 = vadd.f32 %v680_v28, %v2786_v9  ;;  %v772_v55 = vpop.f32.mrf.mxu1 }
 0x19d   : > { %v682_v3 = vpop.f32.mrf.mxu0 }
 0x19e   : > { %v683_v33 = vadd.f32 %v682_v3, %v2790_v14  ;;  %1069 = vmatprep.mubr.f32.mxu1 %v834_v31  ;;  %v835_v59 = vmax.f32 %v681_v49, 0.0  ;;  %v731_v49 = vadd.f32 %v2806_v13, %v2790_v14 }
 0x19f   : > { %v686_v36 = vpop.f32.mrf.mxu0  ;;  %1070 = vmatmul.mubr.f32.gmra.mxu1 %v833_v37  ;;  %v850_v37 = vmax.f32 %v725_v62, 0.0 }
 0x1a0   : > { %v836_v52 = vmax.f32 %v683_v33, 0.0  ;;  %v687_v0 = vadd.f32 %v686_v36, %v2786_v9  ;;  %v723_v33 = vadd.f32 %v2794_v29, %v2786_v9  ;;  %v2879_v36 = vpop.f32.mrf.mxu1  ;;  %v852_v41 = vmax.f32 %v731_v49, 0.0 }
 0x1a1   : > { %v688_v27 = vpop.f32.mrf.mxu0  ;;  %v743_v29 = vadd.f32 %v2828_v12, %v2790_v14  ;;  %v755_v12 = vadd.f32 %v2848_v8, %v2790_v14  ;;  %v767_v8 = vadd.f32 %v2864_v11, %v2790_v14 }
 0x1a2   : > { %v689_v43 = vadd.f32 %v688_v27, %v2790_v14  ;;  %1075 = vmatprep.mubr.f32.mxu1 %v836_v52  ;;  %v837_v40 = vmax.f32 %v687_v0, 0.0  ;;  %v737_v52 = vadd.f32 %v2816_v16, %v2790_v14  ;;  %v729_v0 = vadd.f32 %v2802_v58, %v2786_v9  ;;  %v778_v27 = vpop.f32.mrf.mxu1 }
 0x1a3   : > { %v692_v57 = vpop.f32.mrf.mxu0  ;;  %1076 = vmatmul.mubr.f32.gmra.mxu1 %v835_v59  ;;  %v849_v59 = vmax.f32 %v723_v33, 0.0  ;;  %v749_v16 = vadd.f32 %v2840_v50, %v2790_v14  ;;  %v741_v58 = vadd.f32 %v2822_v48, %v2786_v9  ;;  %v761_v50 = vadd.f32 %v2856_v54, %v2790_v14 }
 0x1a4   : > { %v838_v45 = vmax.f32 %v689_v43, 0.0  ;;  %v693_v35 = vadd.f32 %v692_v57, %v2786_v9  ;;  %v854_v13 = vmax.f32 %v737_v52, 0.0  ;;  %v851_v43 = vmax.f32 %v729_v0, 0.0 }
 0x1a5   : > { %v694_v25 = vpop.f32.mrf.mxu0  ;;  %v735_v57 = vadd.f32 %v2810_v47, %v2786_v9  ;;  %v747_v47 = vadd.f32 %v2834_v20, %v2786_v9  ;;  %v753_v48 = vadd.f32 %v2844_v24, %v2786_v9  ;;  %v759_v20 = vadd.f32 %v2852_v39, %v2786_v9 }
 0x1a6   : > { %v695_v42 = vadd.f32 %v694_v25, %v2790_v14  ;;  %1081 = vmatprep.mubr.f32.mxu1 %v838_v45  ;;  %v839_v6 = vmax.f32 %v693_v35, 0.0  ;;  %v782_v45 = vpop.f32.mrf.mxu1  ;;  %v773_v54 = vadd.f32 %v772_v55, %v2790_v14  ;;  %v765_v24 = vadd.f32 %v2860_v60, %v2786_v9 }
 0x1a7   : > { %v698_v51 = vpop.f32.mrf.mxu0  ;;  %1082 = vmatmul.mubr.f32.gmra.mxu1 %v837_v40  ;;  %v856_v40 = vmax.f32 %v743_v29, 0.0  ;;  %v853_v35 = vmax.f32 %v735_v57, 0.0  ;;  %v779_v11 = vadd.f32 %v778_v27, %v2790_v14  ;;  %v771_v39 = vadd.f32 %v2868_v44, %v2786_v9 }
 0x1a8   : > { %v840_v61 = vmax.f32 %v695_v42, 0.0  ;;  %v699_v21 = vadd.f32 %v698_v51, %v2786_v9  ;;  %v784_v25 = vpop.f32.mrf.mxu1  ;;  %v858_v42 = vmax.f32 %v749_v16, 0.0  ;;  %v855_v51 = vmax.f32 %v741_v58, 0.0 }
 0x1a9   : > { %v700_v15 = vpop.f32.mrf.mxu0  ;;  %v785_v60 = vadd.f32 %v784_v25, %v2790_v14 }
 0x1aa   : > { %v701_v23 = vadd.f32 %v700_v15, %v2790_v14  ;;  %1087 = vmatprep.mubr.f32.mxu1 %v840_v61  ;;  %v841_v63 = vmax.f32 %v699_v21, 0.0  ;;  %v788_v61 = vpop.f32.mrf.mxu1  ;;  %v857_v21 = vmax.f32 %v747_v47, 0.0 }
 0x1ab   : > { %v704_v30 = vpop.f32.mrf.mxu0  ;;  %1088 = vmatmul.mubr.f32.gmra.mxu1 %v839_v6  ;;  %v860_v6 = vmax.f32 %v755_v12, 0.0 }
 0x1ac   : > { %v842_v18 = vmax.f32 %v701_v23, 0.0  ;;  %v705_v1 = vadd.f32 %v704_v30, %v2786_v9  ;;  %v790_v15 = vpop.f32.mrf.mxu1  ;;  %v862_v23 = vmax.f32 %v761_v50, 0.0  ;;  %v859_v30 = vmax.f32 %v753_v48, 0.0 }
 0x1ad   : > { %v706_v4 = vpop.f32.mrf.mxu0  ;;  %v791_v44 = vadd.f32 %v790_v15, %v2790_v14 }
 0x1ae   : > { %v707_v17 = vadd.f32 %v706_v4, %v2790_v14  ;;  %1093 = vmatprep.mubr.f32.mxu1 %v842_v18  ;;  %v843_v32 = vmax.f32 %v705_v1, 0.0  ;;  %v794_v18 = vpop.f32.mrf.mxu1  ;;  %v861_v1 = vmax.f32 %v759_v20, 0.0 }
 0x1af   : > { %v710_v22 = vpop.f32.mrf.mxu0  ;;  %1094 = vmatmul.mubr.f32.gmra.mxu1 %v841_v63  ;;  %v864_v63 = vmax.f32 %v767_v8, 0.0  ;;  %v872_v49 = vmax.f32 %v791_v44, 0.0 }
 0x1b0   : > { %v844_v26 = vmax.f32 %v707_v17, 0.0  ;;  %v711_v34 = vadd.f32 %v710_v22, %v2786_v9  ;;  %v796_v4 = vpop.f32.mrf.mxu1  ;;  %v866_v17 = vmax.f32 %v773_v54, 0.0 }
 0x1b1   : > { %v712_v38 = vpop.f32.mrf.mxu0 }
 0x1b2   : > { %v713_v46 = vadd.f32 %v712_v38, %v2790_v14  ;;  %1099 = vmatprep.mubr.f32.mxu1 %v844_v26  ;;  %v845_v5 = vmax.f32 %v711_v34, 0.0  ;;  %v863_v26 = vmax.f32 %v765_v24, 0.0  ;;  %v868_v38 = vmax.f32 %v779_v11, 0.0 }
 0x1b3   : > { %v716_v53 = vpop.f32.mrf.mxu0  ;;  %1100 = vmatmul.mubr.f32.gmra.mxu1 %v843_v32  ;;  %v800_v32 = vpop.f32.mrf.mxu1 }
 0x1b4   : > { %v846_v56 = vmax.f32 %v713_v46, 0.0  ;;  %v717_v10 = vadd.f32 %v716_v53, %v2786_v9  ;;  %v865_v53 = vmax.f32 %v771_v39, 0.0  ;;  %v801_v25 = vadd.f32 %v800_v32, %v2786_v9 }
 0x1b5   : > { %v718_v19 = vpop.f32.mrf.mxu0  ;;  %v802_v62 = vpop.f32.mrf.mxu1 }
 0x1b6   : > { %v719_v28 = vadd.f32 %v718_v19, %v2790_v14  ;;  %1105 = vmatprep.mubr.f32.mxu1 %v846_v56  ;;  %v847_v3 = vmax.f32 %v717_v10, 0.0  ;;  %v777_v56 = vadd.f32 %v2879_v36, %v2786_v9  ;;  %v870_v10 = vmax.f32 %v785_v60, 0.0  ;;  %v945_v60 = vld [vmem:[%s3352_s4] sm:$0x3] }
 0x1b7   : > { %1106 = vmatmul.mubr.f32.gmra.mxu1 %v845_v5  ;;  %v803_v27 = vadd.f32 %v802_v62, %v2790_v14  ;;  %v1599_v62 = vld [vmem:[%s3354_s6] sm:$0x3] }
 0x1b8   : > { %v848_v31 = vmax.f32 %v719_v28, 0.0  ;;  %v867_v55 = vmax.f32 %v777_v56, 0.0  ;;  %v783_v28 = vadd.f32 %v782_v45, %v2786_v9  ;;  %v2991_v56 = vrot.slane %v945_v60, %v2779_v2 }
 0x1ba   : > { %1111 = vmatprep.mubr.f32.mxu1 %v848_v31  ;;  %v806_v31 = vpop.f32.mrf.mxu1  ;;  %v869_v36 = vmax.f32 %v783_v28, 0.0 }
 0x1bb   : > { %1112 = vmatmul.mubr.f32.gmra.mxu1 %v847_v3  ;;  %v797_v3 = vadd.f32 %v796_v4, %v2790_v14 }
 0x1bc   : > { %1117 = vmatprep.mubr.f32.mxu1 %v850_v37  ;;  %v808_v52 = vpop.f32.mrf.mxu1 }
 0x1bd   : > { %v874_v0 = vmax.f32 %v797_v3, 0.0  ;;  %v809_v16 = vadd.f32 %v808_v52, %v2790_v14 }
 0x1be   : > { %v812_v57 = vpop.f32.mrf.mxu1 }
 0x1bf   : > { %1118 = vmatmul.mubr.f32.gmra.mxu1 %v849_v59  ;;  %v813_v15 = vadd.f32 %v812_v57, %v2786_v9 }
 0x1c0   : > { %1123 = vmatprep.mubr.f32.mxu1 %v852_v41  ;;  %v789_v41 = vadd.f32 %v788_v61, %v2786_v9  ;;  %v875_v61 = vmax.f32 %v801_v25, 0.0 }
 0x1c1   : > { %v879_v8 = vmax.f32 %v813_v15, 0.0 }
 0x1c2   : > { %v871_v29 = vmax.f32 %v789_v41, 0.0  ;;  %v3008_v41 = vrot.slane %v1599_v62, %v2782_v7 }
 0x1c3   : > { %1124 = vmatmul.mubr.f32.gmra.mxu1 %v851_v43  ;;  %v795_v43 = vadd.f32 %v794_v18, %v2786_v9 }
 0x1c4   : > { %1129 = vmatprep.mubr.f32.mxu1 %v854_v13 }
 0x1c5   : > { %v873_v58 = vmax.f32 %v795_v43, 0.0 }
 0x1c7   : > { %1130 = vmatmul.mubr.f32.gmra.mxu1 %v853_v35 }
 0x1c8   : > { %1135 = vmatprep.mubr.f32.mxu1 %v856_v40  ;;  %v876_v40 = vmax.f32 %v803_v27, 0.0 }
 0x1cb   : > { %1136 = vmatmul.mubr.f32.gmra.mxu1 %v855_v51  ;;  %v878_v51 = vmax.f32 %v809_v16, 0.0 }
 0x1cc   : > { %1141 = vmatprep.mubr.f32.mxu1 %v858_v42  ;;  %v814_v42 = vpop.f32.mrf.mxu1 }
 0x1cd   : > { %v815_v47 = vadd.f32 %v814_v42, %v2790_v14 }
 0x1cf   : > { %1142 = vmatmul.mubr.f32.gmra.mxu1 %v857_v21  ;;  %v880_v21 = vmax.f32 %v815_v47, 0.0 }
 0x1d0   : > { %1147 = vmatprep.mubr.f32.mxu1 %v860_v6  ;;  %v807_v6 = vadd.f32 %v806_v31, %v2786_v9  ;;  %v3003_v31 = vrot.slane %v1599_v62, %v2779_v2 }
 0x1d2   : > { %v877_v48 = vmax.f32 %v807_v6, 0.0 }
 0x1d3   : > { %1148 = vmatmul.mubr.f32.gmra.mxu1 %v859_v30 }
 0x1d4   : > { %1153 = vmatprep.mubr.f32.mxu1 %v862_v23 }
 0x1d7   : > { %1154 = vmatmul.mubr.f32.gmra.mxu1 %v861_v1 }
 0x1d8   : > { %1159 = vmatprep.mubr.f32.mxu1 %v864_v63  ;;  %v2909_v22 = vpop.f32.mrf.mxu0 }
 0x1da   : > { %v2913_v34 = vpop.f32.mrf.mxu0 }
 0x1db   : > { %1160 = vmatmul.mubr.f32.gmra.mxu1 %v863_v26 }
 0x1dc   : > { %1165 = vmatprep.mubr.f32.mxu1 %v866_v17  ;;  %v2916_v46 = vpop.f32.mrf.mxu0 }
 0x1de   : > { %v2920_v5 = vpop.f32.mrf.mxu0 }
 0x1df   : > { %1166 = vmatmul.mubr.f32.gmra.mxu1 %v865_v53 }
 0x1e0   : > { %1171 = vmatprep.mubr.f32.mxu1 %v868_v38  ;;  %v2923_v19 = vpop.f32.mrf.mxu0 }
 0x1e2   : > { %v2926_v37 = vpop.f32.mrf.mxu0 }
 0x1e3   : > { %1172 = vmatmul.mubr.f32.gmra.mxu1 %v867_v55 }
 0x1e4   : > { %1177 = vmatprep.mubr.f32.mxu1 %v870_v10  ;;  %v2929_v33 = vpop.f32.mrf.mxu0  ;;  %v2997_v10 = vrot.slane %v945_v60, %v2782_v7 }
 0x1e6   : > { %v2932_v59 = vpop.f32.mrf.mxu0 }
 0x1e7   : > { %1178 = vmatmul.mubr.f32.gmra.mxu1 %v869_v36 }
 0x1e8   : > { %1183 = vmatprep.mubr.f32.mxu1 %v872_v49  ;;  %v2935_v13 = vpop.f32.mrf.mxu0 }
 0x1ea   : > { %v2938_v45 = vpop.f32.mrf.mxu0 }
 0x1eb   : > { %1184 = vmatmul.mubr.f32.gmra.mxu1 %v871_v29 }
 0x1ec   : > { %1189 = vmatprep.mubr.f32.mxu1 %v874_v0  ;;  %v2941_v35 = vpop.f32.mrf.mxu0 }
 0x1ee   : > { %v2944_v12 = vpop.f32.mrf.mxu0 }
 0x1ef   : > { %1190 = vmatmul.mubr.f32.gmra.mxu1 %v873_v58 }
 0x1f0   : > { %1195 = vmatprep.mubr.f32.mxu1 %v876_v40  ;;  %v2948_v50 = vpop.f32.mrf.mxu0 }
 0x1f2   : > { %v2951_v23 = vpop.f32.mrf.mxu0 }
 0x1f3   : > { %1196 = vmatmul.mubr.f32.gmra.mxu1 %v875_v61 }
 0x1f4   : > { %1201 = vmatprep.mubr.f32.mxu1 %v878_v51  ;;  %v2953_v30 = vpop.f32.mrf.mxu0 }
 0x1f6   : > { %v2955_v14 = vpop.f32.mrf.mxu0 }
 0x1f7   : > { %1202 = vmatmul.mubr.f32.gmra.mxu1 %v877_v48 }
 0x1f8   : > { %1207 = vmatprep.mubr.f32.mxu1 %v880_v21  ;;  %v2957_v20 = vpop.f32.mrf.mxu0 }
 0x1fa   : > { %v2959_v18 = vpop.f32.mrf.mxu0 }
 0x1fb   : > { %1208 = vmatmul.mubr.f32.gmra.mxu1 %v879_v8 }
 0x1fc   : > { %v2961_v63 = vpop.f32.mrf.mxu0 }
 0x1fe   : > { %v2963_v54 = vpop.f32.mrf.mxu0 }
 0x200   : > { %v2965_v1 = vpop.f32.mrf.mxu0 }
 0x202   : > { %v2967_v9 = vpop.f32.mrf.mxu0 }
 0x204   : > { %v2969_v24 = vpop.f32.mrf.mxu0 }
 0x206   : > { %v2971_v4 = vpop.f32.mrf.mxu0 }
 0x208   : > { %v2973_v17 = vpop.f32.mrf.mxu0 }
 0x20a   : > { %v2975_v11 = vpop.f32.mrf.mxu0 }
 0x20c   : > { %v2977_v26 = vpop.f32.mrf.mxu0 }
 0x20e   : > { %v2979_v39 = vpop.f32.mrf.mxu0 }
 0x210   : > { %v2981_v32 = vpop.f32.mrf.mxu0 }
 0x212   : > { %v2983_v38 = vpop.f32.mrf.mxu0 }
 0x214   : > { %v2988_v53 = vpop.f32.mrf.mxu0 }
 0x216   : > { %v2999_v55 = vpop.f32.mrf.mxu0 }
 0x218   : > { %v3010_v0 = vpop.f32.mrf.mxu0 }
 0x21a   : > { %v3023_v16 = vpop.f32.mrf.mxu0 }
 0x21c   : > { %v3033_v6 = vpop.f32.mrf.mxu0 }
 0x23f   : > { %v1023_v44 = vpop.f32.mrf.mxu1 }
 0x240   : > { %v1024_v28 = vadd.f32 %v1023_v44, %v2991_v56  ;;  %v3043_v44 = vpop.f32.mrf.mxu0 }
 0x241   : > { %v1025_v49 = vpop.f32.mrf.mxu1 }
 0x242   : > { %v1535_v3 = vadd.f32 %v2909_v22, %v1024_v28  ;;  %v1026_v36 = vadd.f32 %v1025_v49, %v2997_v10 }
 0x243   : > { %v1029_v52 = vpop.f32.mrf.mxu1 }
 0x244   : > { %v1611_v27 = vadd.f32 %v3003_v31, %v1535_v3  ;;  %v1536_v29 = vadd.f32 %v2913_v34, %v1026_v36  ;;  %v1030_v43 = vadd.f32 %v1029_v52, %v2991_v56 }
 0x245   : > { %v1031_v57 = vpop.f32.mrf.mxu1 }
 0x246   : > { %1675 = vst [vmem:[%s3017_s12] sm:$0xff] %v1611_v27  ;;  %v1612_v2 = vadd.f32 %v3008_v41, %v1536_v29  ;;  %v1537_v7 = vadd.f32 %v2916_v46, %v1030_v43  ;;  %v1032_v22 = vadd.f32 %v1031_v57, %v2997_v10  ;;  %v3053_v29 = vpop.f32.mrf.mxu0 }
 0x247   : > { %v1035_v40 = vpop.f32.mrf.mxu1 }
 0x248   : > { %1676 = vst [vmem:[%s3017_s12 + $0x8] sm:$0xff] %v1612_v2  ;;  %v1613_v34 = vadd.f32 %v3003_v31, %v1537_v7  ;;  %v1538_v58 = vadd.f32 %v2920_v5, %v1032_v22  ;;  %v1036_v25 = vadd.f32 %v1035_v40, %v2991_v56 }
 0x249   : > { %v1037_v42 = vpop.f32.mrf.mxu1 }
 0x24a   : > { %1677 = vst [vmem:[%s3017_s12 + $0x10] sm:$0xff] %v1613_v34  ;;  %v1614_v51 = vadd.f32 %v3008_v41, %v1538_v58  ;;  %v1539_v46 = vadd.f32 %v2923_v19, %v1036_v25  ;;  %v1038_v47 = vadd.f32 %v1037_v42, %v2997_v10  ;;  %v3063_v34 = vpop.f32.mrf.mxu0 }
 0x24b   : > { %v1041_v61 = vpop.f32.mrf.mxu1 }
 0x24c   : > { %1678 = vst [vmem:[%s3017_s12 + $0x18] sm:$0xff] %v1614_v51  ;;  %v1615_v21 = vadd.f32 %v3003_v31, %v1539_v46  ;;  %v1540_v5 = vadd.f32 %v2926_v37, %v1038_v47  ;;  %v1042_v48 = vadd.f32 %v1041_v61, %v2991_v56  ;;  %v3073_v61 = vpop.f32.mrf.mxu0 }
 0x24d   : > { %v1043_v15 = vpop.f32.mrf.mxu1 }
 0x24e   : > { %1679 = vst [vmem:[%s3017_s12 + $0x20] sm:$0xff] %v1615_v21  ;;  %v1616_v8 = vadd.f32 %v3008_v41, %v1540_v5  ;;  %v1541_v19 = vadd.f32 %v2929_v33, %v1042_v48  ;;  %v1044_v60 = vadd.f32 %v1043_v15, %v2997_v10 }
 0x24f   : > { %v1047_v62 = vpop.f32.mrf.mxu1 }
 0x250   : > { %1680 = vst [vmem:[%s3017_s12 + $0x28] sm:$0xff] %v1616_v8  ;;  %v1617_v28 = vadd.f32 %v3003_v31, %v1541_v19  ;;  %v1542_v37 = vadd.f32 %v2932_v59, %v1044_v60  ;;  %v1048_v49 = vadd.f32 %v1047_v62, %v2991_v56  ;;  %v3083_v60 = vpop.f32.mrf.mxu0 }
 0x251   : > { %v1049_v3 = vpop.f32.mrf.mxu1 }
 0x252   : > { %1681 = vst [vmem:[%s3017_s12 + $0x30] sm:$0xff] %v1617_v28  ;;  %v1618_v36 = vadd.f32 %v3008_v41, %v1542_v37  ;;  %v1543_v33 = vadd.f32 %v2935_v13, %v1048_v49  ;;  %v1050_v52 = vadd.f32 %v1049_v3, %v2997_v10 }
 0x253   : > { %v1053_v27 = vpop.f32.mrf.mxu1 }
 0x254   : > { %1682 = vst [vmem:[%s3017_s12 + $0x38] sm:$0xff] %v1618_v36  ;;  %v1619_v43 = vadd.f32 %v3003_v31, %v1543_v33  ;;  %v1544_v59 = vadd.f32 %v2938_v45, %v1050_v52  ;;  %v1054_v57 = vadd.f32 %v1053_v27, %v2991_v56  ;;  %v3093_v33 = vpop.f32.mrf.mxu0 }
 0x255   : > { %v1055_v2 = vpop.f32.mrf.mxu1 }
 0x256   : > { %1683 = vst [vmem:[%s3017_s12 + $0x40] sm:$0xff] %v1619_v43  ;;  %v1620_v7 = vadd.f32 %v3008_v41, %v1544_v59  ;;  %v1545_v13 = vadd.f32 %v2941_v35, %v1054_v57  ;;  %v1056_v22 = vadd.f32 %v1055_v2, %v2997_v10 }
 0x257   : > { %v1059_v40 = vpop.f32.mrf.mxu1 }
 0x258   : > { %1684 = vst [vmem:[%s3017_s12 + $0x48] sm:$0xff] %v1620_v7  ;;  %v1621_v58 = vadd.f32 %v3003_v31, %v1545_v13  ;;  %v1546_v45 = vadd.f32 %v2944_v12, %v1056_v22  ;;  %v1060_v25 = vadd.f32 %v1059_v40, %v2991_v56  ;;  %v3103_v7 = vpop.f32.mrf.mxu0 }
 0x259   : > { %v1061_v42 = vpop.f32.mrf.mxu1 }
 0x25a   : > { %1685 = vst [vmem:[%s3017_s12 + $0x50] sm:$0xff] %v1621_v58  ;;  %v1622_v51 = vadd.f32 %v3008_v41, %v1546_v45  ;;  %v1547_v35 = vadd.f32 %v2948_v50, %v1060_v25  ;;  %v1062_v46 = vadd.f32 %v1061_v42, %v2997_v10  ;;  %v3113_v42 = vpop.f32.mrf.mxu0 }
 0x25b   : > { %v1065_v47 = vpop.f32.mrf.mxu1 }
 0x25c   : > { %1686 = vst [vmem:[%s3017_s12 + $0x58] sm:$0xff] %v1622_v51  ;;  %v1623_v21 = vadd.f32 %v3003_v31, %v1547_v35  ;;  %v1548_v12 = vadd.f32 %v2951_v23, %v1062_v46  ;;  %v1066_v5 = vadd.f32 %v1065_v47, %v2991_v56 }
 0x25d   : > { %v1067_v48 = vpop.f32.mrf.mxu1 }
 0x25e   : > { %1687 = vst [vmem:[%s3017_s12 + $0x60] sm:$0xff] %v1623_v21  ;;  %v1624_v15 = vadd.f32 %v3008_v41, %v1548_v12  ;;  %v1549_v50 = vadd.f32 %v2953_v30, %v1066_v5  ;;  %v1068_v8 = vadd.f32 %v1067_v48, %v2997_v10  ;;  %v3123_v5 = vpop.f32.mrf.mxu0 }
 0x25f   : > { %v1071_v19 = vpop.f32.mrf.mxu1 }
 0x260   : > { %1688 = vst [vmem:[%s3017_s12 + $0x68] sm:$0xff] %v1624_v15  ;;  %v1625_v62 = vadd.f32 %v3003_v31, %v1549_v50  ;;  %v1550_v23 = vadd.f32 %v2955_v14, %v1068_v8  ;;  %v1072_v28 = vadd.f32 %v1071_v19, %v2991_v56 }
 0x261   : > { %v1073_v37 = vpop.f32.mrf.mxu1 }
 0x262   : > { %1689 = vst [vmem:[%s3017_s12 + $0x70] sm:$0xff] %v1625_v62  ;;  %v1626_v49 = vadd.f32 %v3008_v41, %v1550_v23  ;;  %v1551_v30 = vadd.f32 %v2957_v20, %v1072_v28  ;;  %v1074_v3 = vadd.f32 %v1073_v37, %v2997_v10  ;;  %v3133_v23 = vpop.f32.mrf.mxu0 }
 0x263   : > { %v1077_v36 = vpop.f32.mrf.mxu1 }
 0x264   : > { %1690 = vst [vmem:[%s3017_s12 + $0x78] sm:$0xff] %v1626_v49  ;;  %v1627_v52 = vadd.f32 %v3003_v31, %v1551_v30  ;;  %v1552_v14 = vadd.f32 %v2959_v18, %v1074_v3  ;;  %v1078_v27 = vadd.f32 %v1077_v36, %v2991_v56 }
 0x265   : > { %v1079_v43 = vpop.f32.mrf.mxu1 }
 0x266   : > { %1691 = vst [vmem:[%s3017_s12 + $0x80] sm:$0xff] %v1627_v52  ;;  %v1628_v59 = vadd.f32 %v3008_v41, %v1552_v14  ;;  %v1553_v20 = vadd.f32 %v2961_v63, %v1078_v27  ;;  %v1080_v57 = vadd.f32 %v1079_v43, %v2997_v10  ;;  %v3143_v52 = vpop.f32.mrf.mxu0 }
 0x267   : > { %v1083_v2 = vpop.f32.mrf.mxu1 }
 0x268   : > { %1692 = vst [vmem:[%s3017_s12 + $0x88] sm:$0xff] %v1628_v59  ;;  %v1629_v13 = vadd.f32 %v3003_v31, %v1553_v20  ;;  %v1554_v18 = vadd.f32 %v2963_v54, %v1080_v57  ;;  %v1084_v22 = vadd.f32 %v1083_v2, %v2991_v56  ;;  %v3153_v2 = vpop.f32.mrf.mxu0 }
 0x269   : > { %v1085_v40 = vpop.f32.mrf.mxu1 }
 0x26a   : > { %1693 = vst [vmem:[%s3017_s12 + $0x90] sm:$0xff] %v1629_v13  ;;  %v1630_v58 = vadd.f32 %v3008_v41, %v1554_v18  ;;  %v1555_v63 = vadd.f32 %v2965_v1, %v1084_v22  ;;  %v1086_v45 = vadd.f32 %v1085_v40, %v2997_v10 }
 0x26b   : > { %v1089_v25 = vpop.f32.mrf.mxu1 }
 0x26c   : > { %1694 = vst [vmem:[%s3017_s12 + $0x98] sm:$0xff] %v1630_v58  ;;  %v1631_v51 = vadd.f32 %v3003_v31, %v1555_v63  ;;  %v1556_v54 = vadd.f32 %v2967_v9, %v1086_v45  ;;  %v1090_v35 = vadd.f32 %v1089_v25, %v2991_v56  ;;  %v3163_v45 = vpop.f32.mrf.mxu0 }
 0x26d   : > { %v1091_v46 = vpop.f32.mrf.mxu1 }
 0x26e   : > { %1695 = vst [vmem:[%s3017_s12 + $0xa0] sm:$0xff] %v1631_v51  ;;  %v1632_v47 = vadd.f32 %v3008_v41, %v1556_v54  ;;  %v1557_v1 = vadd.f32 %v2969_v24, %v1090_v35  ;;  %v1092_v21 = vadd.f32 %v1091_v46, %v2997_v10 }
 0x26f   : > { %v1095_v12 = vpop.f32.mrf.mxu1 }
 0x270   : > { %1696 = vst [vmem:[%s3017_s12 + $0xa8] sm:$0xff] %v1632_v47  ;;  %v1633_v48 = vadd.f32 %v3003_v31, %v1557_v1  ;;  %v1558_v9 = vadd.f32 %v2971_v4, %v1092_v21  ;;  %v1096_v15 = vadd.f32 %v1095_v12, %v2991_v56  ;;  %v3173_v1 = vpop.f32.mrf.mxu0 }
 0x271   : > { %v1097_v50 = vpop.f32.mrf.mxu1 }
 0x272   : > { %1697 = vst [vmem:[%s3017_s12 + $0xb0] sm:$0xff] %v1633_v48  ;;  %v1634_v8 = vadd.f32 %v3008_v41, %v1558_v9  ;;  %v1559_v24 = vadd.f32 %v2973_v17, %v1096_v15  ;;  %v1098_v19 = vadd.f32 %v1097_v50, %v2997_v10 }
 0x273   : > { %v1101_v62 = vpop.f32.mrf.mxu1 }
 0x274   : > { %1698 = vst [vmem:[%s3017_s12 + $0xb8] sm:$0xff] %v1634_v8  ;;  %v1635_v28 = vadd.f32 %v3003_v31, %v1559_v24  ;;  %v1560_v4 = vadd.f32 %v2975_v11, %v1098_v19  ;;  %v1102_v37 = vadd.f32 %v1101_v62, %v2991_v56  ;;  %v3183_v8 = vpop.f32.mrf.mxu0 }
 0x275   : > { %v1103_v49 = vpop.f32.mrf.mxu1 }
 0x276   : > { %1699 = vst [vmem:[%s3017_s12 + $0xc0] sm:$0xff] %v1635_v28  ;;  %v1636_v30 = vadd.f32 %v3008_v41, %v1560_v4  ;;  %v1561_v17 = vadd.f32 %v2977_v26, %v1102_v37  ;;  %v1104_v3 = vadd.f32 %v1103_v49, %v2997_v10  ;;  %v3193_v49 = vpop.f32.mrf.mxu0 }
 0x277   : > { %v1107_v36 = vpop.f32.mrf.mxu1 }
 0x278   : > { %1700 = vst [vmem:[%s3017_s12 + $0xc8] sm:$0xff] %v1636_v30  ;;  %v1637_v14 = vadd.f32 %v3003_v31, %v1561_v17  ;;  %v1562_v11 = vadd.f32 %v2979_v39, %v1104_v3  ;;  %v1108_v27 = vadd.f32 %v1107_v36, %v2991_v56 }
 0x279   : > { %v1109_v43 = vpop.f32.mrf.mxu1 }
 0x27a   : > { %1701 = vst [vmem:[%s3017_s12 + $0xd0] sm:$0xff] %v1637_v14  ;;  %v1638_v59 = vadd.f32 %v3008_v41, %v1562_v11  ;;  %v1563_v26 = vadd.f32 %v2981_v32, %v1108_v27  ;;  %v1110_v20 = vadd.f32 %v1109_v43, %v2997_v10  ;;  %v3203_v27 = vpop.f32.mrf.mxu0 }
 0x27b   : > { %v1113_v57 = vpop.f32.mrf.mxu1 }
 0x27c   : > { %1702 = vst [vmem:[%s3017_s12 + $0xd8] sm:$0xff] %v1638_v59  ;;  %v1639_v13 = vadd.f32 %v3003_v31, %v1563_v26  ;;  %v1564_v39 = vadd.f32 %v2983_v38, %v1110_v20  ;;  %v1114_v18 = vadd.f32 %v1113_v57, %v2991_v56 }
 0x27d   : > { %v1115_v22 = vpop.f32.mrf.mxu1 }
 0x27e   : > { %1703 = vst [vmem:[%s3017_s12 + $0xe0] sm:$0xff] %v1639_v13  ;;  %v1640_v40 = vadd.f32 %v3008_v41, %v1564_v39  ;;  %v1565_v32 = vadd.f32 %v2988_v53, %v1114_v18  ;;  %v1116_v58 = vadd.f32 %v1115_v22, %v2997_v10  ;;  %v3213_v39 = vpop.f32.mrf.mxu0 }
 0x27f   : > { %v1119_v63 = vpop.f32.mrf.mxu1 }
 0x280   : > { %1704 = vst [vmem:[%s3017_s12 + $0xe8] sm:$0xff] %v1640_v40  ;;  %v1641_v25 = vadd.f32 %v3003_v31, %v1565_v32  ;;  %v1566_v38 = vadd.f32 %v2999_v55, %v1116_v58  ;;  %v1120_v51 = vadd.f32 %v1119_v63, %v2991_v56 }
 0x281   : > { %v1121_v54 = vpop.f32.mrf.mxu1 }
 0x282   : > { %1705 = vst [vmem:[%s3017_s12 + $0xf0] sm:$0xff] %v1641_v25  ;;  %v1642_v35 = vadd.f32 %v3008_v41, %v1566_v38  ;;  %v1567_v53 = vadd.f32 %v3010_v0, %v1120_v51  ;;  %v1122_v46 = vadd.f32 %v1121_v54, %v2997_v10  ;;  %v1502_v25 = vpop.f32.mrf.mxu0 }
 0x283   : > { %v1125_v47 = vpop.f32.mrf.mxu1 }
 0x284   : > { %1706 = vst [vmem:[%s3017_s12 + $0xf8] sm:$0xff] %v1642_v35  ;;  %v1643_v21 = vadd.f32 %v3003_v31, %v1567_v53  ;;  %v1568_v55 = vadd.f32 %v3023_v16, %v1122_v46  ;;  %v1126_v12 = vadd.f32 %v1125_v47, %v2991_v56  ;;  %v1506_v47 = vpop.f32.mrf.mxu0 }
 0x285   : > { %v1127_v48 = vpop.f32.mrf.mxu1 }
 0x286   : > { %1707 = vst [vmem:[%s3017_s12 + $0x100] sm:$0xff] %v1643_v21  ;;  %v1644_v9 = vadd.f32 %v3008_v41, %v1568_v55  ;;  %v1569_v0 = vadd.f32 %v3033_v6, %v1126_v12  ;;  %v1128_v15 = vadd.f32 %v1127_v48, %v2997_v10 }
 0x287   : > { %v1131_v50 = vpop.f32.mrf.mxu1 }
 0x288   : > { %1708 = vst [vmem:[%s3017_s12 + $0x108] sm:$0xff] %v1644_v9  ;;  %v1645_v24 = vadd.f32 %v3003_v31, %v1569_v0  ;;  %v1570_v16 = vadd.f32 %v3043_v44, %v1128_v15  ;;  %v1132_v19 = vadd.f32 %v1131_v50, %v2991_v56  ;;  %v1508_v15 = vpop.f32.mrf.mxu0 }
 0x289   : > { %v1133_v62 = vpop.f32.mrf.mxu1 }
 0x28a   : > { %1709 = vst [vmem:[%s3017_s12 + $0x110] sm:$0xff] %v1645_v24  ;;  %v1646_v28 = vadd.f32 %v3008_v41, %v1570_v16  ;;  %v1571_v6 = vadd.f32 %v3053_v29, %v1132_v19  ;;  %v1134_v4 = vadd.f32 %v1133_v62, %v2997_v10 }
 0x28b   : > { %v1137_v37 = vpop.f32.mrf.mxu1 }
 0x28c   : > { %1710 = vst [vmem:[%s3017_s12 + $0x118] sm:$0xff] %v1646_v28  ;;  %v1647_v30 = vadd.f32 %v3003_v31, %v1571_v6  ;;  %v1572_v44 = vadd.f32 %v3063_v34, %v1134_v4  ;;  %v1138_v17 = vadd.f32 %v1137_v37, %v2991_v56  ;;  %v1512_v6 = vpop.f32.mrf.mxu0 }
 0x28d   : > { %v1139_v3 = vpop.f32.mrf.mxu1 }
 0x28e   : > { %1711 = vst [vmem:[%s3017_s12 + $0x120] sm:$0xff] %v1647_v30  ;;  %v1648_v36 = vadd.f32 %v3008_v41, %v1572_v44  ;;  %v1573_v29 = vadd.f32 %v3073_v61, %v1138_v17  ;;  %v1140_v14 = vadd.f32 %v1139_v3, %v2997_v10 }
 0x28f   : > { %v1143_v11 = vpop.f32.mrf.mxu1 }
 0x290   : > { %1712 = vst [vmem:[%s3017_s12 + $0x128] sm:$0xff] %v1648_v36  ;;  %v1649_v43 = vadd.f32 %v3003_v31, %v1573_v29  ;;  %v1574_v34 = vadd.f32 %v3083_v60, %v1140_v14  ;;  %v1144_v59 = vadd.f32 %v1143_v11, %v2991_v56  ;;  %v1514_v36 = vpop.f32.mrf.mxu0 }
 0x291   : > { %v1145_v26 = vpop.f32.mrf.mxu1 }
 0x292   : > { %1713 = vst [vmem:[%s3017_s12 + $0x130] sm:$0xff] %v1649_v43  ;;  %v1650_v20 = vadd.f32 %v3008_v41, %v1574_v34  ;;  %v1575_v61 = vadd.f32 %v3093_v33, %v1144_v59  ;;  %v1146_v57 = vadd.f32 %v1145_v26, %v2997_v10  ;;  %v1518_v26 = vpop.f32.mrf.mxu0 }
 0x293   : > { %v1149_v13 = vpop.f32.mrf.mxu1 }
 0x294   : > { %1714 = vst [vmem:[%s3017_s12 + $0x138] sm:$0xff] %v1650_v20  ;;  %v1651_v18 = vadd.f32 %v3003_v31, %v1575_v61  ;;  %v1576_v60 = vadd.f32 %v3103_v7, %v1146_v57  ;;  %v1150_v22 = vadd.f32 %v1149_v13, %v2991_v56 }
 0x295   : > { %v1151_v40 = vpop.f32.mrf.mxu1 }
 0x296   : > { %1715 = vst [vmem:[%s3017_s12 + $0x140] sm:$0xff] %v1651_v18  ;;  %v1652_v32 = vadd.f32 %v3008_v41, %v1576_v60  ;;  %v1577_v33 = vadd.f32 %v3113_v42, %v1150_v22  ;;  %v1152_v58 = vadd.f32 %v1151_v40, %v2997_v10  ;;  %v1520_v22 = vpop.f32.mrf.mxu0 }
 0x297   : > { %v1155_v63 = vpop.f32.mrf.mxu1 }
 0x298   : > { %1716 = vst [vmem:[%s3017_s12 + $0x148] sm:$0xff] %v1652_v32  ;;  %v1653_v38 = vadd.f32 %v3003_v31, %v1577_v33  ;;  %v1578_v51 = vadd.f32 %v3123_v5, %v1152_v58  ;;  %v1156_v7 = vadd.f32 %v1155_v63, %v2991_v56 }
 0x299   : > { %v1157_v54 = vpop.f32.mrf.mxu1 }
 0x29a   : > { %1717 = vst [vmem:[%s3017_s12 + $0x150] sm:$0xff] %v1653_v38  ;;  %v1654_v35 = vadd.f32 %v3008_v41, %v1578_v51  ;;  %v1579_v53 = vadd.f32 %v3133_v23, %v1156_v7  ;;  %v1158_v42 = vadd.f32 %v1157_v54, %v2997_v10  ;;  %v1524_v7 = vpop.f32.mrf.mxu0 }
 0x29b   : > { %v1161_v46 = vpop.f32.mrf.mxu1 }
 0x29c   : > { %1718 = vst [vmem:[%s3017_s12 + $0x158] sm:$0xff] %v1654_v35  ;;  %v1655_v21 = vadd.f32 %v3003_v31, %v1579_v53  ;;  %v1580_v55 = vadd.f32 %v3143_v52, %v1158_v42  ;;  %v1162_v5 = vadd.f32 %v1161_v46, %v2991_v56 }
 0x29d   : > { %v1163_v12 = vpop.f32.mrf.mxu1 }
 0x29e   : > { %1719 = vst [vmem:[%s3017_s12 + $0x160] sm:$0xff] %v1655_v21  ;;  %v1656_v48 = vadd.f32 %v3008_v41, %v1580_v55  ;;  %v1581_v9 = vadd.f32 %v3153_v2, %v1162_v5  ;;  %v1164_v23 = vadd.f32 %v1163_v12, %v2997_v10  ;;  %v1526_v5 = vpop.f32.mrf.mxu0 }
 0x29f   : > { %v1167_v0 = vpop.f32.mrf.mxu1 }
 0x2a0   : > { %1720 = vst [vmem:[%s3017_s12 + $0x168] sm:$0xff] %v1656_v48  ;;  %v1657_v50 = vadd.f32 %v3003_v31, %v1581_v9  ;;  %v1582_v24 = vadd.f32 %v3163_v45, %v1164_v23  ;;  %v1168_v52 = vadd.f32 %v1167_v0, %v2991_v56 }
 0x2a1   : > { %v1169_v16 = vpop.f32.mrf.mxu1 }
 0x2a2   : > { %1721 = vst [vmem:[%s3017_s12 + $0x170] sm:$0xff] %v1657_v50  ;;  %v1658_v19 = vadd.f32 %v3008_v41, %v1582_v24  ;;  %v1583_v62 = vadd.f32 %v3173_v1, %v1168_v52  ;;  %v1170_v2 = vadd.f32 %v1169_v16, %v2997_v10  ;;  %v1530_v52 = vpop.f32.mrf.mxu0 }
 0x2a3   : > { %v1173_v28 = vpop.f32.mrf.mxu1 }
 0x2a4   : > { %1722 = vst [vmem:[%s3017_s12 + $0x178] sm:$0xff] %v1658_v19  ;;  %v1659_v4 = vadd.f32 %v3003_v31, %v1583_v62  ;;  %v1584_v37 = vadd.f32 %v3183_v8, %v1170_v2  ;;  %v1174_v45 = vadd.f32 %v1173_v28, %v2991_v56 }
 0x2a5   : > { %v1175_v30 = vpop.f32.mrf.mxu1 }
 0x2a6   : > { %1723 = vst [vmem:[%s3017_s12 + $0x180] sm:$0xff] %v1659_v4  ;;  %v1660_v44 = vadd.f32 %v3008_v41, %v1584_v37  ;;  %v1585_v17 = vadd.f32 %v3193_v49, %v1174_v45  ;;  %v1176_v1 = vadd.f32 %v1175_v30, %v2997_v10  ;;  %v1532_v37 = vpop.f32.mrf.mxu0 }
 0x2a7   : > { %v1179_v3 = vpop.f32.mrf.mxu1 }
 0x2a8   : > { %1724 = vst [vmem:[%s3017_s12 + $0x188] sm:$0xff] %v1660_v44  ;;  %v1661_v29 = vadd.f32 %v3003_v31, %v1585_v17  ;;  %v1586_v14 = vadd.f32 %v3203_v27, %v1176_v1  ;;  %v1180_v8 = vadd.f32 %v1179_v3, %v2991_v56 }
 0x2a9   : > { %v1181_v11 = vpop.f32.mrf.mxu1 }
 0x2aa   : > { %1725 = vst [vmem:[%s3017_s12 + $0x190] sm:$0xff] %v1661_v29  ;;  %v1662_v43 = vadd.f32 %v3008_v41, %v1586_v14  ;;  %v1587_v34 = vadd.f32 %v3213_v39, %v1180_v8  ;;  %v1182_v49 = vadd.f32 %v1181_v11, %v2997_v10 }
 0x2ab   : > { %v1185_v59 = vpop.f32.mrf.mxu1 }
 0x2ac   : > { %1726 = vst [vmem:[%s3017_s12 + $0x198] sm:$0xff] %v1662_v43  ;;  %v1663_v20 = vadd.f32 %v3003_v31, %v1587_v34  ;;  %v1588_v61 = vadd.f32 %v1502_v25, %v1182_v49  ;;  %v1186_v27 = vadd.f32 %v1185_v59, %v2991_v56 }
 0x2ad   : > { %v1187_v57 = vpop.f32.mrf.mxu1 }
 0x2ae   : > { %1727 = vst [vmem:[%s3017_s12 + $0x1a0] sm:$0xff] %v1663_v20  ;;  %v1664_v13 = vadd.f32 %v3008_v41, %v1588_v61  ;;  %v1589_v18 = vadd.f32 %v1506_v47, %v1186_v27  ;;  %v1188_v60 = vadd.f32 %v1187_v57, %v2997_v10 }
 0x2af   : > { %v1191_v39 = vpop.f32.mrf.mxu1 }
 0x2b0   : > { %1728 = vst [vmem:[%s3017_s12 + $0x1a8] sm:$0xff] %v1664_v13  ;;  %v1665_v40 = vadd.f32 %v3003_v31, %v1589_v18  ;;  %v1590_v32 = vadd.f32 %v1508_v15, %v1188_v60  ;;  %v1192_v33 = vadd.f32 %v1191_v39, %v2991_v56 }
 0x2b1   : > { %v1193_v58 = vpop.f32.mrf.mxu1 }
 0x2b2   : > { %1729 = vst [vmem:[%s3017_s12 + $0x1b0] sm:$0xff] %v1665_v40  ;;  %v1666_v63 = vadd.f32 %v3008_v41, %v1590_v32  ;;  %v1591_v25 = vadd.f32 %v1512_v6, %v1192_v33  ;;  %v1194_v38 = vadd.f32 %v1193_v58, %v2997_v10 }
 0x2b3   : > { %v1197_v51 = vpop.f32.mrf.mxu1 }
 0x2b4   : > { %1730 = vst [vmem:[%s3017_s12 + $0x1b8] sm:$0xff] %v1666_v63  ;;  %v1667_v54 = vadd.f32 %v3003_v31, %v1591_v25  ;;  %v1592_v35 = vadd.f32 %v1514_v36, %v1194_v38  ;;  %v1198_v53 = vadd.f32 %v1197_v51, %v2991_v56 }
 0x2b5   : > { %v1199_v42 = vpop.f32.mrf.mxu1 }
 0x2b6   : > { %1731 = vst [vmem:[%s3017_s12 + $0x1c0] sm:$0xff] %v1667_v54  ;;  %v1668_v46 = vadd.f32 %v3008_v41, %v1592_v35  ;;  %v1593_v47 = vadd.f32 %v1518_v26, %v1198_v53  ;;  %v1200_v21 = vadd.f32 %v1199_v42, %v2997_v10 }
 0x2b7   : > { %v1203_v55 = vpop.f32.mrf.mxu1 }
 0x2b8   : > { %1732 = vst [vmem:[%s3017_s12 + $0x1c8] sm:$0xff] %v1668_v46  ;;  %v1669_v12 = vadd.f32 %v3003_v31, %v1593_v47  ;;  %v1594_v48 = vadd.f32 %v1520_v22, %v1200_v21  ;;  %v1204_v9 = vadd.f32 %v1203_v55, %v2991_v56 }
 0x2b9   : > { %v1205_v23 = vpop.f32.mrf.mxu1 }
 0x2ba   : > { %1733 = vst [vmem:[%s3017_s12 + $0x1d0] sm:$0xff] %v1669_v12  ;;  %v1670_v0 = vadd.f32 %v3008_v41, %v1594_v48  ;;  %v1595_v15 = vadd.f32 %v1524_v7, %v1204_v9  ;;  %v1206_v50 = vadd.f32 %v1205_v23, %v2997_v10 }
 0x2bb   : > { %v1209_v24 = vpop.f32.mrf.mxu1 }
 0x2bc   : > { %1734 = vst [vmem:[%s3017_s12 + $0x1d8] sm:$0xff] %v1670_v0  ;;  %v1671_v16 = vadd.f32 %v3003_v31, %v1595_v15  ;;  %v1596_v19 = vadd.f32 %v1526_v5, %v1206_v50  ;;  %v1210_v62 = vadd.f32 %v1209_v24, %v2991_v56 }
 0x2bd   : > { %v1211_v2 = vpop.f32.mrf.mxu1 }
 0x2be   : > { %1735 = vst [vmem:[%s3017_s12 + $0x1e0] sm:$0xff] %v1671_v16  ;;  %v1672_v28 = vadd.f32 %v3008_v41, %v1596_v19  ;;  %v1597_v6 = vadd.f32 %v1530_v52, %v1210_v62  ;;  %v1212_v4 = vadd.f32 %v1211_v2, %v2997_v10 }
 0x2c0   : > { %1736 = vst [vmem:[%s3017_s12 + $0x1e8] sm:$0xff] %v1672_v28  ;;  %v1673_v45 = vadd.f32 %v3003_v31, %v1597_v6  ;;  %v1598_v30 = vadd.f32 %v1532_v37, %v1212_v4 }
 0x2c2   : > { %1737 = vst [vmem:[%s3017_s12 + $0x1f0] sm:$0xff] %v1673_v45  ;;  %v1674_v56 = vadd.f32 %v3008_v41, %v1598_v30 }
 0x2c4   : > { %1738 = vst [vmem:[%s3017_s12 + $0x1f8] sm:$0xff] %v1674_v56 }
 0x2c5   : > { %2194 = shalt.err (!%p2191_p5)
}
 0x2c6   : > { %s2195_s30 = scalar_lea.hbm %s3300_s18, 8192  ;;  %s2199_s20 = scalar_lea.hbm %s3355_s7, 16384 }
 0x2c7   : > { %p2196_p6 = scmp.ne.s32.totalorder %s3300_s18, %s2195_s30  ;;  %p2200_p9 = scmp.lt.s32.totalorder %s3300_s18, %s3355_s7 }
 0x2c8   : > { %p2201_p11 = scmp.lt.s32.totalorder %s2199_s20, %s2195_s30 }
 0x2c9   : > { %p2197_p4 = pnand %p2196_p6, %p3424_p12 }
 0x2ca   : > { %p2202_p0 = por %p2201_p11, %p2200_p9 }
 0x2cb   : > { %p2198_p8 = pneg %p2197_p4 }
 0x2cd   : > { %p2203_p2 = pnand %p2202_p0, %p2198_p8 }
 0x2cf   : > { %2206 = shalt.err (!%p2203_p2)
}
 0x2d0   : > { %s2263_s10 = smov 256   ;;  %s2264_s13 = smov 16  }
 0x2d1   : > { %1975 = dma.vmem_to_hbm [thread:$0]  (%p3424_p12), %s3302_s16, 8192, %s3300_s18, %s1740_s28, %s2263_s10, %s2263_s10, %s2264_s13  }
 0x2d2 PF: > { %s1769_s14 = sand.u32 1, %s2241_s24   ;;  %p3425_p10 = scmp.ne.s32.totalorder %s3379_s8, 0 }
 0x2d3   : > { %p3426_p7 = scmp.ge.s32.totalorder %s2253_s27, 2  ;;  %s1770_s1 = scalar_lea.sflag [#allocation4], %s1769_s14 }
 0x2d5   : > { %p1995_p1 = pnand %p3426_p7, %p3425_p10 }
 0x2d7   : > { %p1996_p13 = pneg %p1995_p1 }
 0x2d9   : > { %2236 = dma.done.wait (%p1996_p13), %s1770_s1, 8192  }
 0x2da   : > { %2238 = vsyncadd (%p1996_p13), %s1770_s1, 4294959104  ;;  %p22_p3 = scmp.ge.s32.totalorder %s2402_s21, 4   ;;  %s3427_s24 = smov %s2245_s25 }
 0x2db   : > { %s3428_s25 = smov %s2249_s26  ;;  %s3429_s26 = smov %s2418_s29 }
 0x2dc   : > { %s3430_s27 = smov %s2402_s21  ;;  %24 = sbr.rel (!%p22_p3) target bundleno = 9 (0x9), region = 109 }
 0x2e1   :  { %1775 = vsyncpa [#allocation3], 1 }
 0x2e2   :  { %1777 = vsyncpa [#allocation3 + $0x1], 1 }
 0x2e3   :  { %1778 = vsyncpa [#allocation6], 1 }
 0x2e4   :  { %1779 = vsyncpa [#allocation9], 1 }
 0x2e5   :  { %1780 = vsyncpa [#allocation4], 1 }
 0x2e6   :  { %1782 = vsyncpa [#allocation4 + $0x1], 1 }

</bundles_post_ra>
